<compile_context>
chip_gen: v7x
topology: tpu7x:2x2x1
jax: 0.10.0
libtpu: 0.0.40
codegen_flags: <defaults>
</compile_context>

<pallas_src>
import math

import jax
import jax.numpy as jnp
from jax import lax
from jax.experimental import pallas as pl
from jax.experimental.pallas import tpu as pltpu


def _round_up(x: int, m: int) -> int:
    return ((x + m - 1) // m) * m


def _make_ffn_kernel(d_model: int, eps: float):
    inv_dm1 = 1.0 / float(d_model - 1)

    def kernel(x_ref, w1_ref, b1_ref, w2_ref, b2_ref, g_ref, beta_ref, o_ref):
        x = x_ref[...]                                            # (TM, D) f32

        # --- FFN: Linear(D->2D) -> ReLU -> Linear(2D->D); bf16 MXU, f32 acc ---
        h = jnp.dot(x.astype(jnp.bfloat16), w1_ref[...],
                    preferred_element_type=jnp.float32)           # (TM, H)
        h = jnp.maximum(h + b1_ref[...], 0.0)
        y = jnp.dot(h.astype(jnp.bfloat16), w2_ref[...],
                    preferred_element_type=jnp.float32)           # (TM, D)
        y = y + b2_ref[...]

        # --- residual + LayerNorm (torch: unbiased std; eps added to std**2) ---
        z = x + y
        mean = jnp.mean(z, axis=-1, keepdims=True)
        d = z - mean
        var_unbiased = jnp.sum(d * d, axis=-1, keepdims=True) * inv_dm1
        out = g_ref[...] * (d * lax.rsqrt(var_unbiased + eps)) + beta_ref[...]

        o_ref[...] = out.astype(o_ref.dtype)

    return kernel


def ffn_forward(x, params, *, eps=1e-6, tile_rows=256):
    """x: (B, S, D) float32.  params: dict of w1,b1,w2,b2,gamma,beta (f32)."""
    B, S, D = x.shape
    H = params["w1"].shape[1]
    N = B * S
    xf = x.reshape(N, D)

    # Row tile: big (MXU-friendly), 8-aligned, never larger than the padded row count.
    tr = min(_round_up(tile_rows, 8), _round_up(N, 8))
    n_pad = _round_up(N, tr)
    if n_pad != N:
        xf = jnp.pad(xf, ((0, n_pad - N), (0, 0)))   # padded rows are sliced off below
    grid = (pl.cdiv(n_pad, tr),)

    # bf16 weights for the MXU (halves weight DMA bytes and VMEM). In real use the
    # weights would simply be stored as bf16; biases/gamma/beta stay f32 (tiny).
    w1 = params["w1"].astype(jnp.bfloat16)
    w2 = params["w2"].astype(jnp.bfloat16)

    kernel = _make_ffn_kernel(D, eps)

    # Operands with a constant index_map do not need double-buffering.
    def resident_spec(shape):
        return pl.BlockSpec(shape, lambda i: (0, 0), pipeline_mode=pl.Buffered(1))

    # Rough resident-VMEM requirement; only raise the scoped limit when needed.
    vmem_needed = (
        4 * tr * D * 4              # x + out tiles, f32, double-buffered
        + tr * H * 4                # hidden activation scratch
        + 2 * D * H * 2             # bf16 weights (single-buffered)
        + (H + 3 * D) * 4           # b1, b2, gamma, beta (f32)
    )
    vmem_limit = None
    if vmem_needed + (8 << 20) > (32 << 20):      # above the 32 MiB scoped default
        # Sized for v6e/v5e (128 MiB physical).
        # TODO(synk): for d_model >~ 2k on v7x (64 MiB VMEM), add an 'arbitrary'
        # hidden/K grid axis with an f32 accumulator instead of resident weights.
        vmem_limit = min(vmem_needed + (16 << 20), 100 << 20)

    cost = pl.CostEstimate(
        flops=2 * n_pad * D * H * 2 + 10 * n_pad * D,
        transcendentals=n_pad,                     # one rsqrt per row
        bytes_accessed=2 * n_pad * D * 4 + (w1.size + w2.size) * 2 + (H + 3 * D) * 4,
    )

    out = pl.pallas_call(
        kernel,
        out_shape=jax.ShapeDtypeStruct((n_pad, D), x.dtype),
        grid_spec=pltpu.PrefetchScalarGridSpec(
            num_scalar_prefetch=0,
            grid=grid,
            in_specs=[
                pl.BlockSpec((tr, D), lambda i: (i, 0)),   # x row tile (double-buffered)
                resident_spec((D, H)),                     # w1 (bf16)
                resident_spec((1, H)),                     # b1
                resident_spec((H, D)),                     # w2 (bf16)
                resident_spec((1, D)),                     # b2
                resident_spec((1, D)),                     # gamma (a_2)
                resident_spec((1, D)),                     # beta  (b_2)
            ],
            out_specs=pl.BlockSpec((tr, D), lambda i: (i, 0)),
        ),
        compiler_params=pltpu.CompilerParams(
            dimension_semantics=("parallel",),
            vmem_limit_bytes=vmem_limit,
        ),
        cost_estimate=cost,
    )(xf, w1, params["b1"], w2, params["b2"], params["gamma"], params["beta"])

    if n_pad != N:
        out = out[:N]
    return out.reshape(B, S, D)


def init_params(key, d_model):
    """Deterministic init mirroring nn.Linear defaults (uniform +/- 1/sqrt(fan_in))."""
    hidden = int(d_model * 2)
    k1, k2, k3, k4 = jax.random.split(key, 4)
    bound1 = 1.0 / math.sqrt(d_model)
    bound2 = 1.0 / math.sqrt(hidden)
    # Stored transposed relative to torch (torch Linear weight is (out, in));
    # here w1: (in, out) so the kernel does x @ w1 directly.
    w1 = jax.random.uniform(k1, (d_model, hidden), jnp.float32, -bound1, bound1)
    b1 = jax.random.uniform(k2, (1, hidden), jnp.float32, -bound1, bound1)
    w2 = jax.random.uniform(k3, (hidden, d_model), jnp.float32, -bound2, bound2)
    b2 = jax.random.uniform(k4, (1, d_model), jnp.float32, -bound2, bound2)
    gamma = jnp.ones((1, d_model), jnp.float32)   # LayerNorm a_2
    beta = jnp.zeros((1, d_model), jnp.float32)   # LayerNorm b_2
    return dict(w1=w1, b1=b1, w2=w2, b2=b2, gamma=gamma, beta=beta)


def ffn_reference(x, params, eps=1e-6, *, matmul_dtype=jnp.float32):
    """Pure-JAX reference with torch semantics (unbiased std, eps on std**2).

    matmul_dtype=bfloat16 mirrors the kernel's MXU numerics exactly (bf16 inputs,
    f32 accumulation); matmul_dtype=float32 is the full-precision reference."""
    w1 = params["w1"].astype(matmul_dtype)
    w2 = params["w2"].astype(matmul_dtype)
    h = jnp.dot(x.astype(matmul_dtype), w1, preferred_element_type=jnp.float32)
    h = jnp.maximum(h + params["b1"][0], 0.0)
    y = jnp.dot(h.astype(matmul_dtype), w2, preferred_element_type=jnp.float32)
    y = y + params["b2"][0]
    z = x + y
    mean = jnp.mean(z, axis=-1, keepdims=True)
    d = z - mean
    var = jnp.sum(d * d, axis=-1, keepdims=True) / (x.shape[-1] - 1)
    return params["gamma"][0] * d / jnp.sqrt(var + eps) + params["beta"][0]


if __name__ == "__main__":
    key = jax.random.PRNGKey(0)
    kx, kp = jax.random.split(key)

    # Small but lane-aligned demo: d_model=128 (hidden=256), 512 rows -> 2 grid steps.
    B, S, D = 2, 256, 128
    x = jax.random.normal(kx, (B, S, D), jnp.float32)
    params = init_params(kp, D)

    out = jax.block_until_ready(ffn_forward(x, params))
    assert out.shape == (B, S, D)

    # Tight check vs a reference that matches the kernel numerics (bf16 matmul, f32 acc).
    ref_bf16 = ffn_reference(x, params, matmul_dtype=jnp.bfloat16)
    assert jnp.allclose(out, ref_bf16, atol=2e-3, rtol=2e-3), "mismatch vs bf16-matched reference"

    # Looser sanity check vs the full-f32 reference (bf16 MXU inputs in the kernel).
    ref_f32 = ffn_reference(x, params, matmul_dtype=jnp.float32)
    assert jnp.allclose(out, ref_f32, atol=7e-2, rtol=7e-2), "mismatch vs f32 reference"

    print("KERNEL_OK")
</pallas_src>

<mosaic_0001>
module attributes {stable_mosaic.version = 11 : i64} {
  func.func @kernel(%arg0: i32, %arg1: memref<256x128xf32, #tpu.memory_space<vmem>>, %arg2: memref<128x256xbf16, #tpu.memory_space<vmem>>, %arg3: memref<1x256xf32, #tpu.memory_space<vmem>>, %arg4: memref<256x128xbf16, #tpu.memory_space<vmem>>, %arg5: memref<1x128xf32, #tpu.memory_space<vmem>>, %arg6: memref<1x128xf32, #tpu.memory_space<vmem>>, %arg7: memref<1x128xf32, #tpu.memory_space<vmem>>, %arg8: memref<256x128xf32, #tpu.memory_space<vmem>>) attributes {dimension_semantics = [#tpu.dimension_semantics<parallel>], iteration_bounds = array<i64: 2>, scalar_prefetch = 0 : i64, scratch_operands = 0 : i64, tpu.core_type = #tpu.core_type<tc>, window_params = [{transform_indices = @transform_0, window_bounds = array<i64: 256, 128>}, {pipeline_mode = #tpu.pipeline_mode<synchronous>, transform_indices = @transform_1, window_bounds = array<i64: 128, 256>}, {pipeline_mode = #tpu.pipeline_mode<synchronous>, transform_indices = @transform_2, window_bounds = array<i64: 1, 256>}, {pipeline_mode = #tpu.pipeline_mode<synchronous>, transform_indices = @transform_3, window_bounds = array<i64: 256, 128>}, {pipeline_mode = #tpu.pipeline_mode<synchronous>, transform_indices = @transform_4, window_bounds = array<i64: 1, 128>}, {pipeline_mode = #tpu.pipeline_mode<synchronous>, transform_indices = @transform_5, window_bounds = array<i64: 1, 128>}, {pipeline_mode = #tpu.pipeline_mode<synchronous>, transform_indices = @transform_6, window_bounds = array<i64: 1, 128>}, {transform_indices = @transform_7, window_bounds = array<i64: 256, 128>}]} {
    %c0 = arith.constant 0 : index
    %c0_0 = arith.constant 0 : index
    %0 = vector.load %arg1[%c0, %c0_0] : memref<256x128xf32, #tpu.memory_space<vmem>>, vector<256x128xf32>
    %1 = arith.truncf %0 : vector<256x128xf32> to vector<256x128xbf16>
    %c0_1 = arith.constant 0 : index
    %c0_2 = arith.constant 0 : index
    %2 = vector.load %arg2[%c0_1, %c0_2] : memref<128x256xbf16, #tpu.memory_space<vmem>>, vector<128x256xbf16>
    %cst = arith.constant dense<0.000000e+00> : vector<256x256xf32>
    %3 = tpu.matmul %1, %2, %cst {dimension_numbers = #tpu.dot_dimension_numbers<[1], [0], [0], [1], [0, 0, 1, 1], [], []>} : vector<256x128xbf16>, vector<128x256xbf16>, vector<256x256xf32> -> vector<256x256xf32>
    %c0_3 = arith.constant 0 : index
    %c0_4 = arith.constant 0 : index
    %4 = vector.load %arg3[%c0_3, %c0_4] : memref<1x256xf32, #tpu.memory_space<vmem>>, vector<1x256xf32>
    %5 = vector.broadcast %4 : vector<1x256xf32> to vector<256x256xf32>
    %6 = arith.addf %3, %5 : vector<256x256xf32>
    %cst_5 = arith.constant 0.000000e+00 : f32
    %7 = vector.broadcast %cst_5 : f32 to vector<256x256xf32>
    %8 = arith.maximumf %6, %7 : vector<256x256xf32>
    %9 = arith.truncf %8 : vector<256x256xf32> to vector<256x256xbf16>
    %c0_6 = arith.constant 0 : index
    %c0_7 = arith.constant 0 : index
    %10 = vector.load %arg4[%c0_6, %c0_7] : memref<256x128xbf16, #tpu.memory_space<vmem>>, vector<256x128xbf16>
    %cst_8 = arith.constant dense<0.000000e+00> : vector<256x128xf32>
    %11 = tpu.matmul %9, %10, %cst_8 {dimension_numbers = #tpu.dot_dimension_numbers<[1], [0], [0], [1], [0, 0, 1, 1], [], []>} : vector<256x256xbf16>, vector<256x128xbf16>, vector<256x128xf32> -> vector<256x128xf32>
    %c0_9 = arith.constant 0 : index
    %c0_10 = arith.constant 0 : index
    %12 = vector.load %arg5[%c0_9, %c0_10] : memref<1x128xf32, #tpu.memory_space<vmem>>, vector<1x128xf32>
    %13 = vector.broadcast %12 : vector<1x128xf32> to vector<256x128xf32>
    %14 = arith.addf %11, %13 : vector<256x128xf32>
    %15 = arith.addf %0, %14 : vector<256x128xf32>
    %cst_11 = arith.constant dense<0.000000e+00> : vector<256xf32>
    %16 = vector.multi_reduction <add>, %15, %cst_11 [1] : vector<256x128xf32> to vector<256xf32>
    %17 = vector.shape_cast %16 : vector<256xf32> to vector<256x1xf32>
    %cst_12 = arith.constant 1.280000e+02 : f32
    %18 = vector.broadcast %cst_12 : f32 to vector<256x1xf32>
    %19 = arith.divf %17, %18 : vector<256x1xf32>
    %20 = vector.broadcast %19 : vector<256x1xf32> to vector<256x128xf32>
    %21 = arith.subf %15, %20 : vector<256x128xf32>
    %22 = arith.mulf %21, %21 : vector<256x128xf32>
    %cst_13 = arith.constant dense<0.000000e+00> : vector<256xf32>
    %23 = vector.multi_reduction <add>, %22, %cst_13 [1] : vector<256x128xf32> to vector<256xf32>
    %24 = vector.shape_cast %23 : vector<256xf32> to vector<256x1xf32>
    %cst_14 = arith.constant 0.00787401571 : f32
    %25 = vector.broadcast %cst_14 : f32 to vector<256x1xf32>
    %26 = arith.mulf %24, %25 : vector<256x1xf32>
    %c0_15 = arith.constant 0 : index
    %c0_16 = arith.constant 0 : index
    %27 = vector.load %arg6[%c0_15, %c0_16] : memref<1x128xf32, #tpu.memory_space<vmem>>, vector<1x128xf32>
    %cst_17 = arith.constant 9.99999997E-7 : f32
    %28 = vector.broadcast %cst_17 : f32 to vector<256x1xf32>
    %29 = arith.addf %26, %28 : vector<256x1xf32>
    %30 = math.rsqrt %29 : vector<256x1xf32>
    %31 = vector.broadcast %30 : vector<256x1xf32> to vector<256x128xf32>
    %32 = arith.mulf %21, %31 : vector<256x128xf32>
    %33 = vector.broadcast %27 : vector<1x128xf32> to vector<256x128xf32>
    %34 = arith.mulf %33, %32 : vector<256x128xf32>
    %c0_18 = arith.constant 0 : index
    %c0_19 = arith.constant 0 : index
    %35 = vector.load %arg7[%c0_18, %c0_19] : memref<1x128xf32, #tpu.memory_space<vmem>>, vector<1x128xf32>
    %36 = vector.broadcast %35 : vector<1x128xf32> to vector<256x128xf32>
    %37 = arith.addf %34, %36 : vector<256x128xf32>
    %c0_20 = arith.constant 0 : index
    %c0_21 = arith.constant 0 : index
    %38 = vector.load %arg8[%c0_20, %c0_21] : memref<256x128xf32, #tpu.memory_space<vmem>>, vector<256x128xf32>
    tpu.vector_store %arg8[%c0_20, %c0_21], %37 {strides = array<i32>} : memref<256x128xf32, #tpu.memory_space<vmem>>, vector<256x128xf32>,
    return
  }
  func.func @transform_0(%arg0: i32) -> (i32, i32) {
    %c0_i32 = arith.constant 0 : i32
    %c0_i32_0 = arith.constant 0 : i32
    return %arg0, %c0_i32 : i32, i32
  }
  func.func @transform_1(%arg0: i32) -> (i32, i32) {
    %c0_i32 = arith.constant 0 : i32
    %c0_i32_0 = arith.constant 0 : i32
    %c0_i32_1 = arith.constant 0 : i32
    return %c0_i32, %c0_i32_0 : i32, i32
  }
  func.func @transform_2(%arg0: i32) -> (i32, i32) {
    %c0_i32 = arith.constant 0 : i32
    %c0_i32_0 = arith.constant 0 : i32
    %c0_i32_1 = arith.constant 0 : i32
    return %c0_i32, %c0_i32_0 : i32, i32
  }
  func.func @transform_3(%arg0: i32) -> (i32, i32) {
    %c0_i32 = arith.constant 0 : i32
    %c0_i32_0 = arith.constant 0 : i32
    %c0_i32_1 = arith.constant 0 : i32
    return %c0_i32, %c0_i32_0 : i32, i32
  }
  func.func @transform_4(%arg0: i32) -> (i32, i32) {
    %c0_i32 = arith.constant 0 : i32
    %c0_i32_0 = arith.constant 0 : i32
    %c0_i32_1 = arith.constant 0 : i32
    return %c0_i32, %c0_i32_0 : i32, i32
  }
  func.func @transform_5(%arg0: i32) -> (i32, i32) {
    %c0_i32 = arith.constant 0 : i32
    %c0_i32_0 = arith.constant 0 : i32
    %c0_i32_1 = arith.constant 0 : i32
    return %c0_i32, %c0_i32_0 : i32, i32
  }
  func.func @transform_6(%arg0: i32) -> (i32, i32) {
    %c0_i32 = arith.constant 0 : i32
    %c0_i32_0 = arith.constant 0 : i32
    %c0_i32_1 = arith.constant 0 : i32
    return %c0_i32, %c0_i32_0 : i32, i32
  }
  func.func @transform_7(%arg0: i32) -> (i32, i32) {
    %c0_i32 = arith.constant 0 : i32
    %c0_i32_0 = arith.constant 0 : i32
    return %arg0, %c0_i32 : i32, i32
  }
}

</mosaic_0001>

<bundles_post_ra>
// kernel: tpu_custom_call.1
= control target key start
LH: loop header
LB: loop body
LE: loop exit
PB: predicated region body
PF: predicated region fallthrough
CT: control target
= control target key end

     0   :  { %12 = vsyncpa [#allocation3], 0  ;;  %s3152_s0 = inlined_call_operand.hbm [shape: f32[512,128], index: 0, kind: input, shape index: {}]   ;;  %s3153_s1 = inlined_call_operand.hbm [shape: bf16[128,256], index: 1, kind: input, shape index: {}]   ;;  %s3154_s2 = inlined_call_operand.vmem [shape: f32[1,256], index: 2, kind: input, shape index: {}]   ;;  %s3155_s3 = inlined_call_operand.hbm [shape: bf16[256,128], index: 3, kind: input, shape index: {}]   ;;  %s3156_s4 = inlined_call_operand.vmem [shape: f32[1,128], index: 4, kind: input, shape index: {}]   ;;  %s3157_s5 = inlined_call_operand.vmem [shape: f32[1,128], index: 5, kind: input, shape index: {}]   ;;  %s3158_s6 = inlined_call_operand.vmem [shape: f32[1,128], index: 6, kind: input, shape index: {}]   ;;  %s3159_s7 = inlined_call_operand.hbm [shape: f32[512,128], index: 7, kind: output, shape index: {}]  }
   0x1   :  { %14 = vsyncpa [#allocation3 + $0x1], 0 }
   0x2   :  { %15 = vsyncpa [#allocation6], 0 }
   0x3   :  { %16 = vsyncpa [#allocation4], 0 }
   0x4   :  { %18 = vsyncpa [#allocation4 + $0x1], 0  ;;  %s2225_s24 = smov 0   ;;  %s2227_s25 = smov 0  }
   0x5   :  { %s2229_s26 = smov 0   ;;  %s2231_s27 = smov 0  }
   0x6 LB: > { %s2246_s28 = sadd.s32 4294967295, %s2172_s27   ;;  %s1671_s29 = sadd.s32 4294967294, %s2172_s27   ;;  %s2172_s27 = sphi %s2231_s27, %s3181_s27   ;;  %s2168_s26 = sphi %s2229_s26, %s3180_s26   ;;  %s2164_s25 = sphi %s2227_s25, %s3179_s25   ;;  %s2160_s24 = sphi %s2225_s24, %s3178_s24  }
   0x7   : > { %p44_p0 = scmp.ne.s32.totalorder %s2164_s25, %s2160_s24  ;;  %p3160_p1 = scmp.eq.s32.totalorder %s2246_s28, 0 }
   0x8   : > { %p200_p3 = scmp.eq.s32.totalorder %s1671_s29, 1  ;;  %p1672_p5 = scmp.ge.s32.totalorder %s2172_s27, 1 }
   0x9   : > { %p2255_p4 = por %p3160_p1, %p44_p0  ;;  %p207_p7 = scmp.lt.s32.totalorder %s2172_s27, 3 }
   0xa   : > { %p2260_p6 = por %p200_p3, %p44_p0  ;;  %s2174_s10 = smov [#allocation5]  }
   0xb   : > { %s3164_s30 = scalar_select %p2255_p4, 1, 0 }
   0xc   : > { %s3165_s8 = scalar_select %p2260_p6, 1, 0 }
   0xd   : > { %p2265_p8 = pnand %p1672_p5, %p207_p7  ;;  %s219_s11 = sshll.u32 %s2174_s10, 4  ;;  %s2269_s11 = int_to_ptr.vmem [resolvable:$true] %s219_s11 }
   0xe   : > { %s2175_s13 = smov [#allocation7]   ;;  %s2016_s17 = scalar_lea.hbm %s3153_s1, 2048 }
   0xf   : > { %p1850_p9 = pneg %p2265_p8  ;;  %s235_s14 = sshll.u32 %s2175_s13, 4  ;;  %s2280_s14 = int_to_ptr.vmem [resolvable:$true] %s235_s14 }
  0x10   : > { %p2017_p12 = scmp.ne.s32.totalorder %s3153_s1, %s2016_s17  ;;  %p2023_p5 = scmp.lt.u32.totalorder %s2016_s17, %s3153_s1 }
  0x11   : > { %p2276_p11 = pnand %p1850_p9, %p3160_p1 }
  0x13   : > { %p2018_p13 = pneg %p2276_p11 }
  0x15   : > { %p2019_p0 = pnand %p2018_p13, %p2017_p12 }
  0x17   : > { %p2020_p3 = pneg %p2019_p0 }
  0x19   : > { %p2025_p7 = pnand %p2023_p5, %p2020_p3 }
  0x1b   : > { %2028 = shalt.err (!%p2025_p7)
}
  0x1c   : > { %s2029_s22 = scalar_lea.vmem %s2269_s11, 2048  ;;  %p2037_p2 = scmp.lt.s32.totalorder %s2269_s11, %s2269_s11 }
  0x1d   : > { %p2030_p9 = scmp.ne.s32.totalorder %s2269_s11, %s2029_s22  ;;  %p2038_p12 = scmp.lt.s32.totalorder %s2029_s22, %s2029_s22 }
  0x1f   : > { %p2032_p10 = pnand %p2030_p9, %p2018_p13  ;;  %p2039_p0 = por %p2038_p12, %p2037_p2 }
  0x21   : > { %p2033_p1 = pneg %p2032_p10 }
  0x23   : > { %p2040_p6 = pnand %p2039_p0, %p2033_p1 }
  0x25   : > { %2043 = shalt.err (!%p2040_p6)
}
  0x26   : > { %s3161_s23 = smov 128   ;;  %s2177_s29 = smov 8  }
  0x27   : > { %1853 = dma.hbm_to_vmem [thread:$0]  (!%p2276_p11), %s3153_s1, 2048, %s2269_s11, [#allocation6], %s3161_s23, %s3161_s23, %s2177_s29  }
  0x28   : > { %s2044_s17 = scalar_lea.hbm %s3155_s3, 2048 }
  0x29   : > { %p2045_p1 = scmp.ne.s32.totalorder %s3155_s3, %s2044_s17  ;;  %p2051_p10 = scmp.lt.u32.totalorder %s2044_s17, %s3155_s3 }
  0x2b   : > { %p2047_p2 = pnand %p2045_p1, %p2018_p13 }
  0x2d   : > { %p2048_p6 = pneg %p2047_p2 }
  0x2f   : > { %p2053_p3 = pnand %p2051_p10, %p2048_p6 }
  0x31   : > { %2056 = shalt.err (!%p2053_p3)
}
  0x32   : > { %s2057_s11 = scalar_lea.vmem %s2280_s14, 2048  ;;  %p2065_p12 = scmp.lt.s32.totalorder %s2280_s14, %s2280_s14 }
  0x33   : > { %p2058_p5 = scmp.ne.s32.totalorder %s2280_s14, %s2057_s11  ;;  %p2066_p0 = scmp.lt.s32.totalorder %s2057_s11, %s2057_s11 }
  0x35   : > { %p2060_p7 = pnand %p2058_p5, %p2018_p13  ;;  %p2067_p1 = por %p2066_p0, %p2065_p12 }
  0x37   : > { %p2061_p9 = pneg %p2060_p7 }
  0x39   : > { %p2068_p2 = pnand %p2067_p1, %p2061_p9 }
  0x3b   : > { %2071 = shalt.err (!%p2068_p2)
}
  0x3c   : > { %s2178_s22 = smov 64   ;;  %s2179_s10 = smov 4  }
  0x3d   : > { %1856 = dma.hbm_to_vmem [thread:$0]  (!%p2276_p11), %s3155_s3, 2048, %s2280_s14, [#allocation6], %s2178_s22, %s2178_s22, %s2179_s10  }
  0x3e   : > { %s2338_s16 = sadd.s32 1, %s2172_s27   ;;  %s31_s18 = sadd.s32 1, %s2168_s26 }
  0x3f   : > { %s28_s17 = ssub.s32 %s2172_s27, %s2338_s16  ;;  %p38_p6 = scmp.ne.s32.totalorder %s2168_s26, %s2164_s25 }
  0x40   : > { %p29_p13 = scmp.eq.s32.totalorder %s28_s17, 0  ;;  %p39_p10 = scmp.eq.s32.totalorder %s2172_s27, 0 }
  0x41   : > { %p3168_p5 = scmp.eq.s32.totalorder %s2246_s28, 1  ;;  %p1867_p9 = scmp.lt.s32.totalorder %s2172_s27, 2 }
  0x42   : > { %s2347_s19 = scalar_select %p29_p13, %s2168_s26, %s31_s18  }
  0x43   : > { %p40_p3 = por %p39_p10, %p38_p6  ;;  %p2351_p7 = por %p3168_p5, %p38_p6 }
  0x44   : > { %s258_s12 = sand.u32 1, %s2168_s26   ;;  %s1724_s14 = sshll.u32 %s2172_s27, 12 }
  0x45   : > { %s3169_s20 = scalar_select %p2351_p7, 1, 0 }
  0x46   : > { %s1676_s21 = sshll.u32 %s258_s12, 8  ;;  %s2361_s10 = scalar_lea.hbm %s3152_s0, %s1724_s14 }
  0x47   : > { %s262_s13 = scalar_lea.vmem [#allocation2], %s1676_s21  ;;  %p2365_p11 = pnand %p1867_p9, %p40_p3 }
  0x48   : > { %s269_s15 = sshll.u32 %s262_s13, 4  ;;  %s2369_s18 = scalar_lea.sflag [#allocation3], %s258_s12  ;;  %s2363_s15 = int_to_ptr.vmem [resolvable:$true] %s269_s15 }
  0x49   : > { %s2072_s23 = scalar_lea.hbm %s2361_s10, 4096  ;;  %p2074_p0 = pneg %p2365_p11 }
  0x4a   : > { %p2073_p12 = scmp.ne.s32.totalorder %s2361_s10, %s2072_s23  ;;  %s2077_s11 = scalar_lea.hbm %s3152_s0, 8192 }
  0x4b   : > { %p2078_p13 = scmp.lt.u32.totalorder %s2361_s10, %s3152_s0  ;;  %p2079_p6 = scmp.lt.u32.totalorder %s2077_s11, %s2072_s23 }
  0x4c   : > { %p2075_p1 = pnand %p2074_p0, %p2073_p12  ;;  %p2081_p3 = scmp.lt.u32.totalorder %s2072_s23, %s2361_s10 }
  0x4d   : > { %p2080_p10 = por %p2079_p6, %p2078_p13 }
  0x4e   : > { %p2076_p2 = pneg %p2075_p1 }
  0x4f   : > { %p2082_p5 = por %p2081_p3, %p2080_p10 }
  0x51   : > { %p2083_p9 = pnand %p2082_p5, %p2076_p2 }
  0x53   : > { %2086 = shalt.err (!%p2083_p9)
}
  0x54   : > { %s2087_s12 = scalar_lea.vmem %s2363_s15, 4096  ;;  %s2180_s21 = smov [#allocation2]  }
  0x55   : > { %p2088_p12 = scmp.ne.s32.totalorder %s2363_s15, %s2087_s12  ;;  %s2092_s14 = sshll.u32 %s2180_s21, 4  ;;  %s2093_s14 = int_to_ptr.vmem [resolvable:$false] %s2092_s14 }
  0x56   : > { %s2094_s22 = scalar_lea.vmem %s2093_s14, 8192  ;;  %p2095_p4 = scmp.lt.s32.totalorder %s2363_s15, %s2093_s14 }
  0x57   : > { %p2090_p1 = pnand %p2088_p12, %p2074_p0  ;;  %p2096_p13 = scmp.lt.s32.totalorder %s2094_s22, %s2087_s12 }
  0x59   : > { %p2091_p7 = pneg %p2090_p1  ;;  %p2097_p6 = por %p2096_p13, %p2095_p4 }
  0x5b   : > { %p2098_p10 = pnand %p2097_p6, %p2091_p7 }
  0x5d   : > { %2101 = shalt.err (!%p2098_p10)
}
  0x5e   : > { %s3171_s23 = smov 128   ;;  %281 = sbr.rel (%p2265_p8) target bundleno = 1027 (0x403), region = 48 }
  0x5f   : > { %1860 = dma.hbm_to_vmem [thread:$0]  (!%p2365_p11), %s2361_s10, 4096, %s2363_s15, %s2369_s18, %s3171_s23, %s3171_s23, %s2177_s29  }
  0x60   : > { %s2403_s11 = sand.u32 (!%p2265_p8), 1, %s2164_s25   ;;  %p3172_p4 = scmp.ne.s32.totalorder (!%p2265_p8), %s3164_s30, 0 }
  0x61   : > { %s1680_s13 = sshll.u32 (!%p2265_p8), %s2403_s11, 8  ;;  %s284_s12 = scalar_lea.sflag (!%p2265_p8), [#allocation3], %s2403_s11 }
  0x62   : > { %s2409_s17 = scalar_lea.vmem (!%p2265_p8), [#allocation2], %s1680_s13 }
  0x65   : > { %2147 = dma.done.wait (%p3172_p4), %s284_s12, 4096  }
  0x66   : > { %2149 = vsyncadd (%p3172_p4), %s284_s12, 4294963200  ;;  %p3173_p7 = scmp.eq.s32.totalorder %s2246_s28, 0 }
  0x68   : > { %2151 = dma.done.wait (%p3173_p7), [#allocation6], 4096   ;;  %p3174_p8 = pmov %p3173_p7 }
  0x69   : > { %v2181_v0 = vmov 0   ;;  %v1912_v1 = vld [vmem:[#allocation5 + $0x4] ss:$8 sps:$4 sm:$0xff]   ;;  %v1914_v2 = vld [vmem:[#allocation5] ss:$8 sps:$4 sm:$0xff]   ;;  %v1940_v24 = vld [vmem:[#allocation7 + $0x50] sm:$0xff]  }
  0x6a   : > { %2153 = vsyncadd (%p3174_p8), [#allocation6], 4294963200  ;;  %517 = vmatprep.mubr.bf16.mxu0 %v2181_v0  ;;  %485 = vmatprep.subr.bf16.mxu0 %v1912_v1  ;;  %v1915_v3 = vld [vmem:[#allocation5 + $0x14] ss:$8 sps:$4 sm:$0xff]   ;;  %v1917_v4 = vld [vmem:[#allocation5 + $0x10] ss:$8 sps:$4 sm:$0xff]  }
  0x6b   : > { %486 = vmatpush1.bf16.msra.mxu0 %v1914_v2  ;;  %v1918_v5 = vld [vmem:[#allocation5 + $0x24] ss:$8 sps:$4 sm:$0xff]   ;;  %v1920_v6 = vld [vmem:[#allocation5 + $0x20] ss:$8 sps:$4 sm:$0xff]   ;;  %v1921_v7 = vld [vmem:[#allocation5 + $0x34] ss:$8 sps:$4 sm:$0xff]  }
  0x6c   : > { %487 = vmatprep.subr.bf16.mxu0 %v1915_v3  ;;  %v1923_v8 = vld [vmem:[#allocation5 + $0x30] ss:$8 sps:$4 sm:$0xff]   ;;  %v1924_v9 = vld [vmem:[#allocation5 + $0x44] ss:$8 sps:$4 sm:$0xff]   ;;  %v1926_v10 = vld [vmem:[#allocation5 + $0x40] ss:$8 sps:$4 sm:$0xff]  }
  0x6d   : > { %v1927_v11 = vld [vmem:[#allocation5 + $0x54] ss:$8 sps:$4 sm:$0xff]   ;;  %v1929_v12 = vld [vmem:[#allocation5 + $0x50] ss:$8 sps:$4 sm:$0xff]   ;;  %v1930_v13 = vld [vmem:[#allocation5 + $0x64] ss:$8 sps:$4 sm:$0xff]  }
  0x6e   : > { %v1932_v14 = vld [vmem:[#allocation5 + $0x60] ss:$8 sps:$4 sm:$0xff]   ;;  %v1933_v15 = vld [vmem:[#allocation5 + $0x74] ss:$8 sps:$4 sm:$0xff]   ;;  %v1935_v19 = vld [vmem:[#allocation5 + $0x70] ss:$8 sps:$4 sm:$0xff]  }
  0x6f   : > { %488 = vmatpush1.bf16.msra.mxu0 %v1917_v4  ;;  %v1936_v16 = vld [vmem:[#allocation7 + $0x40] sm:$0xff]   ;;  %v1938_v18 = vld [vmem:[#allocation7 + $0x48] sm:$0xff]   ;;  %v1941_v25 = vld [vmem:[#allocation7 + $0x10] sm:$0xff]   ;;  %s2975_s22 = scalar_lea.vmem [#allocation8], %s1680_s13  ;;  %s1725_s23 = sshll.u32 %s2246_s28, 12 }
  0x70   : > { %489 = vmatprep.subr.bf16.mxu0 %v1918_v5  ;;  %v1937_v17 = vld [vmem:[#allocation7] sm:$0xff]   ;;  %v2424_v21 = vld [vmem:[%s2409_s17 + $0x8] sm:$0xff]  ;;  %1726 = vmatprep.subr.bf16.mxu1 %v1936_v16  ;;  %v1942_v26 = vld [vmem:[#allocation7 + $0x58] sm:$0xff]   ;;  %s1579_s13 = sshll.u32 %s2975_s22, 4  ;;  %s3103_s30 = scalar_lea.hbm %s3159_s7, %s1725_s23  ;;  %s3105_s13 = int_to_ptr.vmem [resolvable:$true] %s1579_s13 }
  0x71   : > { %v2421_v20 = vld [vmem:[%s2409_s17] sm:$0xff]  ;;  %1727 = vmatpush3.bf16.msra.mxu1 %v1937_v17  ;;  %v1939_v22 = vld [vmem:[#allocation7 + $0x8] sm:$0xff]   ;;  %v2429_v27 = vld [vmem:[%s2409_s17 + $0x10] sm:$0xff]  ;;  %s1566_s28 = scalar_lea.sflag [#allocation4], %s2403_s11  ;;  %s2102_s9 = scalar_lea.vmem %s3105_s13, 4096 }
  0x72   : > { %v361_v23 = vpack.c.bf16 %v2424_v21, %v2421_v20  ;;  %1728 = vmatprep.subr.bf16.mxu1 %v1938_v18  ;;  %v2432_v28 = vld [vmem:[%s2409_s17 + $0x18] sm:$0xff]  ;;  %v1944_v31 = vld [vmem:[#allocation7 + $0x60] sm:$0xff]   ;;  %v1946_v33 = vld [vmem:[#allocation7 + $0x68] sm:$0xff]   ;;  %v395_v18 = vlaneseq  ;;  %p2103_p11 = scmp.ne.s32.totalorder %s3105_s13, %s2102_s9  ;;  %p3175_p0 = scmp.ne.s32.totalorder %s3169_s20, 0 }
  0x73   : > { %490 = vmatpush1.bf16.msra.mxu0 %v1920_v6  ;;  %v1943_v29 = vld [vmem:[#allocation7 + $0x18] sm:$0xff]   ;;  %v362_v30 = vpack.c.bf16 %v2432_v28, %v2429_v27  ;;  %v1945_v32 = vld [vmem:[#allocation7 + $0x20] sm:$0xff]   ;;  %v2442_v35 = vld [vmem:[%s2409_s17 + $0x28] sm:$0xff]  ;;  %s2182_s29 = smov [#allocation8]  }
  0x74   : > { %491 = vmatprep.subr.bf16.mxu0 %v1921_v7  ;;  %v2439_v34 = vld [vmem:[%s2409_s17 + $0x20] sm:$0xff]  ;;  %v2448_v37 = vld [vmem:[%s2409_s17 + $0x30] sm:$0xff]  ;;  %v2451_v38 = vld [vmem:[%s2409_s17 + $0x38] sm:$0xff]  ;;  %p2104_p2 = pnand %p2103_p11, %p3175_p0  ;;  %s2106_s10 = sshll.u32 %s2182_s29, 4  ;;  %s2107_s10 = int_to_ptr.vmem [resolvable:$false] %s2106_s10 }
  0x75   : > { %1729 = vmatpush3.bf16.msra.mxu1 %v1939_v22  ;;  %v363_v36 = vpack.c.bf16 %v2442_v35, %v2439_v34  ;;  %v364_v39 = vpack.c.bf16 %v2451_v38, %v2448_v37  ;;  %v2457_v40 = vld [vmem:[%s2409_s17 + $0x40] sm:$0xff]  ;;  %v2460_v41 = vld [vmem:[%s2409_s17 + $0x48] sm:$0xff]  ;;  %v2466_v43 = vld [vmem:[%s2409_s17 + $0x50] sm:$0xff]  ;;  %s2108_s15 = scalar_lea.vmem %s2107_s10, 8192  ;;  %p2109_p5 = scmp.lt.s32.totalorder %s3105_s13, %s2107_s10 }
  0x76   : > { %1730 = vmatprep.subr.bf16.mxu1 %v1940_v24  ;;  %v365_v42 = vpack.c.bf16 %v2460_v41, %v2457_v40  ;;  %v2469_v44 = vld [vmem:[%s2409_s17 + $0x58] sm:$0xff]  ;;  %v2475_v46 = vld [vmem:[%s2409_s17 + $0x60] sm:$0xff]  ;;  %v2478_v47 = vld [vmem:[%s2409_s17 + $0x68] sm:$0xff]  ;;  %p2105_p3 = pneg %p2104_p2  ;;  %p2110_p9 = scmp.lt.s32.totalorder %s2108_s15, %s2102_s9 }
  0x77   : > { %492 = vmatpush1.bf16.msra.mxu0 %v1923_v8  ;;  %v366_v45 = vpack.c.bf16 %v2469_v44, %v2466_v43  ;;  %v367_v48 = vpack.c.bf16 %v2478_v47, %v2475_v46  ;;  %v2484_v49 = vld [vmem:[%s2409_s17 + $0x70] sm:$0xff]  ;;  %v2487_v50 = vld [vmem:[%s2409_s17 + $0x78] sm:$0xff]  ;;  %v2493_v52 = vld [vmem:[%s2409_s17 + $0x80] sm:$0xff] }
  0x78   : > { %493 = vmatprep.subr.bf16.mxu0 %v1924_v9  ;;  %v368_v51 = vpack.c.bf16 %v2487_v50, %v2484_v49  ;;  %v2496_v53 = vld [vmem:[%s2409_s17 + $0x88] sm:$0xff]  ;;  %v2502_v55 = vld [vmem:[%s2409_s17 + $0x90] sm:$0xff]  ;;  %v2505_v56 = vld [vmem:[%s2409_s17 + $0x98] sm:$0xff]  ;;  %p2111_p12 = por %p2110_p9, %p2109_p5 }
  0x79   : > { %1731 = vmatpush3.bf16.msra.mxu1 %v1941_v25  ;;  %v369_v54 = vpack.c.bf16 %v2496_v53, %v2493_v52  ;;  %v370_v57 = vpack.c.bf16 %v2505_v56, %v2502_v55  ;;  %v2511_v58 = vld [vmem:[%s2409_s17 + $0xa0] sm:$0xff]  ;;  %v2514_v59 = vld [vmem:[%s2409_s17 + $0xa8] sm:$0xff]  ;;  %v2520_v61 = vld [vmem:[%s2409_s17 + $0xb0] sm:$0xff] }
  0x7a   : > { %1732 = vmatprep.subr.bf16.mxu1 %v1942_v26  ;;  %v371_v60 = vpack.c.bf16 %v2514_v59, %v2511_v58  ;;  %v2523_v62 = vld [vmem:[%s2409_s17 + $0xb8] sm:$0xff]  ;;  %v1947_v63 = vld [vmem:[#allocation7 + $0x28] sm:$0xff]   ;;  %v1948_v2 = vld [vmem:[#allocation7 + $0x70] sm:$0xff]   ;;  %p2112_p1 = pnand %p2111_p12, %p2105_p3 }
  0x7b   : > { %494 = vmatpush1.bf16.msra.mxu0 %v1926_v10  ;;  %v372_v1 = vpack.c.bf16 %v2523_v62, %v2520_v61  ;;  %v1949_v3 = vld [vmem:[#allocation7 + $0x30] sm:$0xff]   ;;  %v1950_v4 = vld [vmem:[#allocation7 + $0x78] sm:$0xff]   ;;  %v2529_v5 = vld [vmem:[%s2409_s17 + $0xc0] sm:$0xff] }
  0x7c   : > { %495 = vmatprep.subr.bf16.mxu0 %v1927_v11  ;;  %v2532_v6 = vld [vmem:[%s2409_s17 + $0xc8] sm:$0xff]  ;;  %v1951_v7 = vld [vmem:[#allocation7 + $0x38] sm:$0xff]   ;;  %v2538_v9 = vld [vmem:[%s2409_s17 + $0xd0] sm:$0xff] }
  0x7d   : > { %1733 = vmatpush3.bf16.msra.mxu1 %v1943_v29  ;;  %v373_v8 = vpack.c.bf16 %v2532_v6, %v2529_v5  ;;  %v2541_v10 = vld [vmem:[%s2409_s17 + $0xd8] sm:$0xff] }
  0x7e   : > { %1734 = vmatprep.subr.bf16.mxu1 %v1944_v31  ;;  %v374_v11 = vpack.c.bf16 %v2541_v10, %v2538_v9  ;;  %v2559_v16 = vld [vmem:[%s2409_s17 + $0xf8] sm:$0xff] }
  0x7f   : > { %496 = vmatpush1.bf16.msra.mxu0 %v1929_v12  ;;  %v2547_v12 = vld [vmem:[%s2409_s17 + $0xe0] sm:$0xff] }
  0x80   : > { %497 = vmatprep.subr.bf16.mxu0 %v1930_v13  ;;  %v2550_v13 = vld [vmem:[%s2409_s17 + $0xe8] sm:$0xff] }
  0x81   : > { %1735 = vmatpush3.bf16.msra.mxu1 %v1945_v32 }
  0x82   : > { %1736 = vmatprep.subr.bf16.mxu1 %v1946_v33 }
  0x83   : > { %498 = vmatpush1.bf16.msra.mxu0 %v1932_v14  ;;  %v375_v14 = vpack.c.bf16 %v2550_v13, %v2547_v12 }
  0x84   : > { %499 = vmatprep.subr.bf16.mxu0 %v1933_v15  ;;  %v2556_v15 = vld [vmem:[%s2409_s17 + $0xf0] sm:$0xff] }
  0x85   : > { %1737 = vmatpush3.bf16.msra.mxu1 %v1947_v63  ;;  %v376_v17 = vpack.c.bf16 %v2559_v16, %v2556_v15 }
  0x86   : > { %1738 = vmatprep.subr.bf16.mxu1 %v1948_v2 }
  0x87   : > { %500 = vmatpush1.bf16.msra.mxu0 %v1935_v19  ;;  %v396_v19 = vshrl.u32 %v395_v18, 7 }
  0x89   : > { %1739 = vmatpush3.bf16.msra.mxu1 %v1949_v3  ;;  %v397_v22 = vsub.s32 0, %v396_v19  ;;  %v401_v24 = vsub.s32 1, %v396_v19 }
  0x8a   : > { %518 = vmatmul.mubr.bf16.vlgmr.msra.gmra.mrb[0].mxu0 %v361_v23  ;;  %1740 = vmatprep.subr.bf16.mxu1 %v1950_v4  ;;  %v393_v23 = vld [vmem:[%s3154_s2] sm:$0x3] }
  0x8b   : > { %527 = vmatprep.mubr.bf16.mxu0 %v2181_v0  ;;  %v2566_v25 = vrot.slane %v393_v23, %v397_v22  ;;  %v2568_v26 = vrot.slane %v393_v23, %v401_v24 }
  0x8d   : > { %1741 = vmatpush3.bf16.msra.mxu1 %v1951_v7 }
  0x92   : > { %528 = vmatmul.mubr.bf16.gmra.mrb[4].mxu0 %v362_v30 }
  0x93   : > { %537 = vmatprep.mubr.bf16.mxu0 %v2181_v0 }
  0x9a   : > { %538 = vmatmul.mubr.bf16.gmra.mrb[8].mxu0 %v363_v36 }
  0x9b   : > { %547 = vmatprep.mubr.bf16.mxu0 %v2181_v0 }
  0xa2   : > { %548 = vmatmul.mubr.bf16.gmra.mrb[12].mxu0 %v364_v39 }
  0xa3   : > { %557 = vmatprep.mubr.bf16.mxu0 %v2181_v0 }
  0xaa   : > { %558 = vmatmul.mubr.bf16.gmra.mrb[16].mxu0 %v365_v42 }
  0xab   : > { %567 = vmatprep.mubr.bf16.mxu0 %v2181_v0 }
  0xb2   : > { %568 = vmatmul.mubr.bf16.gmra.mrb[20].mxu0 %v366_v45 }
  0xb3   : > { %577 = vmatprep.mubr.bf16.mxu0 %v2181_v0 }
  0xba   : > { %578 = vmatmul.mubr.bf16.gmra.mrb[24].mxu0 %v367_v48 }
  0xbb   : > { %587 = vmatprep.mubr.bf16.mxu0 %v2181_v0 }
  0xc2   : > { %588 = vmatmul.mubr.bf16.gmra.mrb[28].mxu0 %v368_v51 }
  0xc3   : > { %597 = vmatprep.mubr.bf16.mxu0 %v2181_v0 }
  0xca   : > { %598 = vmatmul.mubr.bf16.gmra.mrb[32].mxu0 %v369_v54 }
  0xcb   : > { %607 = vmatprep.mubr.bf16.mxu0 %v2181_v0 }
  0xd2   : > { %608 = vmatmul.mubr.bf16.gmra.mrb[36].mxu0 %v370_v57 }
  0xd3   : > { %617 = vmatprep.mubr.bf16.mxu0 %v2181_v0 }
  0xda   : > { %618 = vmatmul.mubr.bf16.gmra.mrb[40].mxu0 %v371_v60 }
  0xdb   : > { %627 = vmatprep.mubr.bf16.mxu0 %v2181_v0 }
  0xe2   : > { %628 = vmatmul.mubr.bf16.gmra.mrb[44].mxu0 %v372_v1 }
  0xe3   : > { %637 = vmatprep.mubr.bf16.mxu0 %v2181_v0 }
  0xea   : > { %638 = vmatmul.mubr.bf16.gmra.mrb[48].mxu0 %v373_v8 }
  0xeb   : > { %647 = vmatprep.mubr.bf16.mxu0 %v2181_v0 }
  0xf2   : > { %648 = vmatmul.mubr.bf16.gmra.mrb[52].mxu0 %v374_v11 }
  0xf3   : > { %657 = vmatprep.mubr.bf16.mxu0 %v2181_v0 }
  0xfa   : > { %658 = vmatmul.mubr.bf16.gmra.mrb[56].mxu0 %v375_v14 }
  0xfb   : > { %667 = vmatprep.mubr.bf16.mxu0 %v2181_v0 }
 0x102   : > { %668 = vmatmul.mubr.bf16.gmra.mrb[60].mxu0 %v376_v17 }
 0x15d   : > { %v519_v0 = vpop.f32.mrb[0].mxu0 }
 0x15e   : > { %v520_v29 = vadd.f32 %v519_v0, %v2566_v25  ;;  %v521_v30 = vpop.f32.mrb[1].mxu0 }
 0x15f   : > { %v522_v31 = vadd.f32 %v521_v30, %v2568_v26  ;;  %v523_v32 = vpop.f32.mrb[2].mxu0 }
 0x160   : > { %v524_v33 = vadd.f32 %v523_v32, %v2566_v25  ;;  %v525_v36 = vpop.f32.mrb[3].mxu0  ;;  %v678_v42 = vmax.f32 %v520_v29, 0.0 }
 0x161   : > { %v526_v39 = vadd.f32 %v525_v36, %v2568_v26  ;;  %v679_v48 = vmax.f32 %v522_v31, 0.0 }
 0x162   : > { %v680_v45 = vmax.f32 %v524_v33, 0.0 }
 0x163   : > { %v681_v51 = vmax.f32 %v526_v39, 0.0 }
 0x164   : > { %v742_v54 = vpack.c.bf16 %v680_v45, %v678_v42 }
 0x165   : > { %v529_v57 = vpop.f32.mrb[4].mxu0  ;;  %v743_v60 = vpack.c.bf16 %v681_v51, %v679_v48 }
 0x166   : > { %v530_v63 = vadd.f32 %v529_v57, %v2566_v25  ;;  %v531_v1 = vpop.f32.mrb[5].mxu0 }
 0x167   : > { %v532_v2 = vadd.f32 %v531_v1, %v2568_v26  ;;  %v533_v3 = vpop.f32.mrb[6].mxu0  ;;  %941 = vmatprep.mubr.bf16.mxu1 %v743_v60 }
 0x168   : > { %v534_v4 = vadd.f32 %v533_v3, %v2566_v25  ;;  %v535_v7 = vpop.f32.mrb[7].mxu0  ;;  %942 = vmatmul.mubr.bf16.vlgmr.msra.gmra.mrb[0].mxu1 %v742_v54  ;;  %v682_v11 = vmax.f32 %v530_v63, 0.0 }
 0x169   : > { %v536_v8 = vadd.f32 %v535_v7, %v2568_v26  ;;  %v683_v17 = vmax.f32 %v532_v2, 0.0 }
 0x16a   : > { %v684_v14 = vmax.f32 %v534_v4, 0.0 }
 0x16b   : > { %v685_v18 = vmax.f32 %v536_v8, 0.0 }
 0x16c   : > { %v744_v19 = vpack.c.bf16 %v684_v14, %v682_v11 }
 0x16d   : > { %v745_v22 = vpack.c.bf16 %v685_v18, %v683_v17  ;;  %v539_v23 = vpop.f32.mrb[8].mxu0 }
 0x16e   : > { %v540_v24 = vadd.f32 %v539_v23, %v2566_v25  ;;  %v541_v0 = vpop.f32.mrb[9].mxu0 }
 0x16f   : > { %v542_v29 = vadd.f32 %v541_v0, %v2568_v26  ;;  %v543_v30 = vpop.f32.mrb[10].mxu0  ;;  %949 = vmatprep.mubr.bf16.mxu1 %v745_v22 }
 0x170   : > { %v544_v31 = vadd.f32 %v543_v30, %v2566_v25  ;;  %v545_v32 = vpop.f32.mrb[11].mxu0  ;;  %950 = vmatmul.mubr.bf16.gmra.mrb[4].mxu1 %v744_v19  ;;  %v686_v36 = vmax.f32 %v540_v24, 0.0 }
 0x171   : > { %v546_v33 = vadd.f32 %v545_v32, %v2568_v26  ;;  %v687_v42 = vmax.f32 %v542_v29, 0.0 }
 0x172   : > { %v688_v39 = vmax.f32 %v544_v31, 0.0 }
 0x173   : > { %v689_v45 = vmax.f32 %v546_v33, 0.0 }
 0x174   : > { %v746_v48 = vpack.c.bf16 %v688_v39, %v686_v36 }
 0x175   : > { %v747_v51 = vpack.c.bf16 %v689_v45, %v687_v42  ;;  %v549_v54 = vpop.f32.mrb[12].mxu0 }
 0x176   : > { %v550_v57 = vadd.f32 %v549_v54, %v2566_v25  ;;  %v551_v60 = vpop.f32.mrb[13].mxu0 }
 0x177   : > { %v552_v63 = vadd.f32 %v551_v60, %v2568_v26  ;;  %v553_v1 = vpop.f32.mrb[14].mxu0  ;;  %957 = vmatprep.mubr.bf16.mxu1 %v747_v51 }
 0x178   : > { %v554_v2 = vadd.f32 %v553_v1, %v2566_v25  ;;  %v555_v3 = vpop.f32.mrb[15].mxu0  ;;  %958 = vmatmul.mubr.bf16.gmra.mrb[8].mxu1 %v746_v48  ;;  %v690_v7 = vmax.f32 %v550_v57, 0.0 }
 0x179   : > { %v556_v4 = vadd.f32 %v555_v3, %v2568_v26  ;;  %v691_v11 = vmax.f32 %v552_v63, 0.0 }
 0x17a   : > { %v692_v8 = vmax.f32 %v554_v2, 0.0 }
 0x17b   : > { %v693_v14 = vmax.f32 %v556_v4, 0.0 }
 0x17c   : > { %v748_v17 = vpack.c.bf16 %v692_v8, %v690_v7 }
 0x17d   : > { %v749_v18 = vpack.c.bf16 %v693_v14, %v691_v11  ;;  %v559_v19 = vpop.f32.mrb[16].mxu0 }
 0x17e   : > { %v560_v22 = vadd.f32 %v559_v19, %v2566_v25  ;;  %v561_v23 = vpop.f32.mrb[17].mxu0 }
 0x17f   : > { %v562_v24 = vadd.f32 %v561_v23, %v2568_v26  ;;  %v563_v0 = vpop.f32.mrb[18].mxu0  ;;  %965 = vmatprep.mubr.bf16.mxu1 %v749_v18 }
 0x180   : > { %v564_v29 = vadd.f32 %v563_v0, %v2566_v25  ;;  %v565_v30 = vpop.f32.mrb[19].mxu0  ;;  %966 = vmatmul.mubr.bf16.gmra.mrb[12].mxu1 %v748_v17  ;;  %v694_v32 = vmax.f32 %v560_v22, 0.0 }
 0x181   : > { %v566_v31 = vadd.f32 %v565_v30, %v2568_v26  ;;  %v695_v36 = vmax.f32 %v562_v24, 0.0 }
 0x182   : > { %v696_v33 = vmax.f32 %v564_v29, 0.0 }
 0x183   : > { %v697_v39 = vmax.f32 %v566_v31, 0.0 }
 0x184   : > { %v750_v42 = vpack.c.bf16 %v696_v33, %v694_v32 }
 0x185   : > { %v751_v45 = vpack.c.bf16 %v697_v39, %v695_v36  ;;  %v569_v48 = vpop.f32.mrb[20].mxu0 }
 0x186   : > { %v570_v51 = vadd.f32 %v569_v48, %v2566_v25  ;;  %v571_v54 = vpop.f32.mrb[21].mxu0 }
 0x187   : > { %v572_v57 = vadd.f32 %v571_v54, %v2568_v26  ;;  %v573_v60 = vpop.f32.mrb[22].mxu0  ;;  %973 = vmatprep.mubr.bf16.mxu1 %v751_v45 }
 0x188   : > { %v574_v63 = vadd.f32 %v573_v60, %v2566_v25  ;;  %v575_v1 = vpop.f32.mrb[23].mxu0  ;;  %974 = vmatmul.mubr.bf16.gmra.mrb[16].mxu1 %v750_v42  ;;  %v698_v3 = vmax.f32 %v570_v51, 0.0 }
 0x189   : > { %v576_v2 = vadd.f32 %v575_v1, %v2568_v26  ;;  %v699_v7 = vmax.f32 %v572_v57, 0.0 }
 0x18a   : > { %v700_v4 = vmax.f32 %v574_v63, 0.0 }
 0x18b   : > { %v701_v8 = vmax.f32 %v576_v2, 0.0 }
 0x18c   : > { %v752_v11 = vpack.c.bf16 %v700_v4, %v698_v3 }
 0x18d   : > { %v753_v14 = vpack.c.bf16 %v701_v8, %v699_v7  ;;  %v579_v17 = vpop.f32.mrb[24].mxu0 }
 0x18e   : > { %v580_v18 = vadd.f32 %v579_v17, %v2566_v25  ;;  %v581_v19 = vpop.f32.mrb[25].mxu0 }
 0x18f   : > { %v582_v22 = vadd.f32 %v581_v19, %v2568_v26  ;;  %v583_v23 = vpop.f32.mrb[26].mxu0  ;;  %981 = vmatprep.mubr.bf16.mxu1 %v753_v14 }
 0x190   : > { %v584_v24 = vadd.f32 %v583_v23, %v2566_v25  ;;  %v585_v0 = vpop.f32.mrb[27].mxu0  ;;  %982 = vmatmul.mubr.bf16.gmra.mrb[20].mxu1 %v752_v11  ;;  %v702_v30 = vmax.f32 %v580_v18, 0.0 }
 0x191   : > { %v586_v29 = vadd.f32 %v585_v0, %v2568_v26  ;;  %v703_v32 = vmax.f32 %v582_v22, 0.0 }
 0x192   : > { %v704_v31 = vmax.f32 %v584_v24, 0.0 }
 0x193   : > { %v705_v33 = vmax.f32 %v586_v29, 0.0 }
 0x194   : > { %v754_v36 = vpack.c.bf16 %v704_v31, %v702_v30 }
 0x195   : > { %v755_v39 = vpack.c.bf16 %v705_v33, %v703_v32  ;;  %v589_v42 = vpop.f32.mrb[28].mxu0 }
 0x196   : > { %v590_v45 = vadd.f32 %v589_v42, %v2566_v25  ;;  %v591_v48 = vpop.f32.mrb[29].mxu0 }
 0x197   : > { %v592_v51 = vadd.f32 %v591_v48, %v2568_v26  ;;  %v593_v54 = vpop.f32.mrb[30].mxu0  ;;  %989 = vmatprep.mubr.bf16.mxu1 %v755_v39 }
 0x198   : > { %v594_v57 = vadd.f32 %v593_v54, %v2566_v25  ;;  %v595_v60 = vpop.f32.mrb[31].mxu0  ;;  %990 = vmatmul.mubr.bf16.gmra.mrb[24].mxu1 %v754_v36  ;;  %v706_v1 = vmax.f32 %v590_v45, 0.0 }
 0x199   : > { %v596_v63 = vadd.f32 %v595_v60, %v2568_v26  ;;  %v707_v3 = vmax.f32 %v592_v51, 0.0 }
 0x19a   : > { %v708_v2 = vmax.f32 %v594_v57, 0.0 }
 0x19b   : > { %v709_v4 = vmax.f32 %v596_v63, 0.0 }
 0x19c   : > { %v756_v7 = vpack.c.bf16 %v708_v2, %v706_v1 }
 0x19d   : > { %v757_v8 = vpack.c.bf16 %v709_v4, %v707_v3  ;;  %v599_v11 = vpop.f32.mrb[32].mxu0 }
 0x19e   : > { %v600_v14 = vadd.f32 %v599_v11, %v2566_v25  ;;  %v601_v17 = vpop.f32.mrb[33].mxu0 }
 0x19f   : > { %v602_v18 = vadd.f32 %v601_v17, %v2568_v26  ;;  %v603_v19 = vpop.f32.mrb[34].mxu0  ;;  %997 = vmatprep.mubr.bf16.mxu1 %v757_v8 }
 0x1a0   : > { %v604_v22 = vadd.f32 %v603_v19, %v2566_v25  ;;  %v605_v23 = vpop.f32.mrb[35].mxu0  ;;  %998 = vmatmul.mubr.bf16.gmra.mrb[28].mxu1 %v756_v7  ;;  %v710_v0 = vmax.f32 %v600_v14, 0.0 }
 0x1a1   : > { %v606_v24 = vadd.f32 %v605_v23, %v2568_v26  ;;  %v711_v30 = vmax.f32 %v602_v18, 0.0 }
 0x1a2   : > { %v712_v29 = vmax.f32 %v604_v22, 0.0 }
 0x1a3   : > { %v713_v31 = vmax.f32 %v606_v24, 0.0 }
 0x1a4   : > { %v758_v32 = vpack.c.bf16 %v712_v29, %v710_v0 }
 0x1a5   : > { %v759_v33 = vpack.c.bf16 %v713_v31, %v711_v30  ;;  %v609_v36 = vpop.f32.mrb[36].mxu0 }
 0x1a6   : > { %v610_v39 = vadd.f32 %v609_v36, %v2566_v25  ;;  %v611_v42 = vpop.f32.mrb[37].mxu0 }
 0x1a7   : > { %v612_v45 = vadd.f32 %v611_v42, %v2568_v26  ;;  %v613_v48 = vpop.f32.mrb[38].mxu0  ;;  %1005 = vmatprep.mubr.bf16.mxu1 %v759_v33 }
 0x1a8   : > { %v614_v51 = vadd.f32 %v613_v48, %v2566_v25  ;;  %v615_v54 = vpop.f32.mrb[39].mxu0  ;;  %1006 = vmatmul.mubr.bf16.gmra.mrb[32].mxu1 %v758_v32  ;;  %v714_v60 = vmax.f32 %v610_v39, 0.0 }
 0x1a9   : > { %v616_v57 = vadd.f32 %v615_v54, %v2568_v26  ;;  %v715_v1 = vmax.f32 %v612_v45, 0.0 }
 0x1aa   : > { %v716_v63 = vmax.f32 %v614_v51, 0.0 }
 0x1ab   : > { %v717_v2 = vmax.f32 %v616_v57, 0.0 }
 0x1ac   : > { %v760_v3 = vpack.c.bf16 %v716_v63, %v714_v60 }
 0x1ad   : > { %v761_v4 = vpack.c.bf16 %v717_v2, %v715_v1  ;;  %v619_v7 = vpop.f32.mrb[40].mxu0 }
 0x1ae   : > { %v620_v8 = vadd.f32 %v619_v7, %v2566_v25  ;;  %v621_v11 = vpop.f32.mrb[41].mxu0 }
 0x1af   : > { %v622_v14 = vadd.f32 %v621_v11, %v2568_v26  ;;  %v623_v17 = vpop.f32.mrb[42].mxu0  ;;  %1013 = vmatprep.mubr.bf16.mxu1 %v761_v4 }
 0x1b0   : > { %v624_v18 = vadd.f32 %v623_v17, %v2566_v25  ;;  %v625_v19 = vpop.f32.mrb[43].mxu0  ;;  %1014 = vmatmul.mubr.bf16.gmra.mrb[36].mxu1 %v760_v3  ;;  %v718_v23 = vmax.f32 %v620_v8, 0.0 }
 0x1b1   : > { %v626_v22 = vadd.f32 %v625_v19, %v2568_v26  ;;  %v719_v0 = vmax.f32 %v622_v14, 0.0 }
 0x1b2   : > { %v720_v24 = vmax.f32 %v624_v18, 0.0 }
 0x1b3   : > { %v721_v29 = vmax.f32 %v626_v22, 0.0 }
 0x1b4   : > { %v762_v30 = vpack.c.bf16 %v720_v24, %v718_v23 }
 0x1b5   : > { %v763_v31 = vpack.c.bf16 %v721_v29, %v719_v0  ;;  %v629_v32 = vpop.f32.mrb[44].mxu0 }
 0x1b6   : > { %v630_v33 = vadd.f32 %v629_v32, %v2566_v25  ;;  %v631_v36 = vpop.f32.mrb[45].mxu0 }
 0x1b7   : > { %v632_v39 = vadd.f32 %v631_v36, %v2568_v26  ;;  %v633_v42 = vpop.f32.mrb[46].mxu0  ;;  %1021 = vmatprep.mubr.bf16.mxu1 %v763_v31 }
 0x1b8   : > { %v634_v45 = vadd.f32 %v633_v42, %v2566_v25  ;;  %v635_v48 = vpop.f32.mrb[47].mxu0  ;;  %1022 = vmatmul.mubr.bf16.gmra.mrb[40].mxu1 %v762_v30  ;;  %v722_v54 = vmax.f32 %v630_v33, 0.0 }
 0x1b9   : > { %v636_v51 = vadd.f32 %v635_v48, %v2568_v26  ;;  %v723_v60 = vmax.f32 %v632_v39, 0.0 }
 0x1ba   : > { %v724_v57 = vmax.f32 %v634_v45, 0.0 }
 0x1bb   : > { %v725_v63 = vmax.f32 %v636_v51, 0.0 }
 0x1bc   : > { %v764_v1 = vpack.c.bf16 %v724_v57, %v722_v54 }
 0x1bd   : > { %v765_v2 = vpack.c.bf16 %v725_v63, %v723_v60  ;;  %v639_v3 = vpop.f32.mrb[48].mxu0 }
 0x1be   : > { %v640_v4 = vadd.f32 %v639_v3, %v2566_v25  ;;  %v641_v7 = vpop.f32.mrb[49].mxu0 }
 0x1bf   : > { %v642_v8 = vadd.f32 %v641_v7, %v2568_v26  ;;  %v643_v11 = vpop.f32.mrb[50].mxu0  ;;  %1029 = vmatprep.mubr.bf16.mxu1 %v765_v2 }
 0x1c0   : > { %v644_v14 = vadd.f32 %v643_v11, %v2566_v25  ;;  %v645_v17 = vpop.f32.mrb[51].mxu0  ;;  %1030 = vmatmul.mubr.bf16.gmra.mrb[44].mxu1 %v764_v1  ;;  %v726_v19 = vmax.f32 %v640_v4, 0.0 }
 0x1c1   : > { %v646_v18 = vadd.f32 %v645_v17, %v2568_v26  ;;  %v727_v23 = vmax.f32 %v642_v8, 0.0 }
 0x1c2   : > { %v728_v22 = vmax.f32 %v644_v14, 0.0 }
 0x1c3   : > { %v729_v24 = vmax.f32 %v646_v18, 0.0 }
 0x1c4   : > { %v766_v0 = vpack.c.bf16 %v728_v22, %v726_v19 }
 0x1c5   : > { %v767_v29 = vpack.c.bf16 %v729_v24, %v727_v23  ;;  %v649_v30 = vpop.f32.mrb[52].mxu0 }
 0x1c6   : > { %v650_v31 = vadd.f32 %v649_v30, %v2566_v25  ;;  %v651_v32 = vpop.f32.mrb[53].mxu0 }
 0x1c7   : > { %v652_v33 = vadd.f32 %v651_v32, %v2568_v26  ;;  %v653_v36 = vpop.f32.mrb[54].mxu0  ;;  %1037 = vmatprep.mubr.bf16.mxu1 %v767_v29 }
 0x1c8   : > { %v654_v39 = vadd.f32 %v653_v36, %v2566_v25  ;;  %v655_v42 = vpop.f32.mrb[55].mxu0  ;;  %1038 = vmatmul.mubr.bf16.gmra.mrb[48].mxu1 %v766_v0  ;;  %v730_v48 = vmax.f32 %v650_v31, 0.0 }
 0x1c9   : > { %v656_v45 = vadd.f32 %v655_v42, %v2568_v26  ;;  %v731_v54 = vmax.f32 %v652_v33, 0.0 }
 0x1ca   : > { %v732_v51 = vmax.f32 %v654_v39, 0.0 }
 0x1cb   : > { %v733_v57 = vmax.f32 %v656_v45, 0.0 }
 0x1cc   : > { %v768_v60 = vpack.c.bf16 %v732_v51, %v730_v48 }
 0x1cd   : > { %v769_v63 = vpack.c.bf16 %v733_v57, %v731_v54  ;;  %v659_v1 = vpop.f32.mrb[56].mxu0 }
 0x1ce   : > { %v660_v2 = vadd.f32 %v659_v1, %v2566_v25  ;;  %v661_v3 = vpop.f32.mrb[57].mxu0 }
 0x1cf   : > { %v662_v4 = vadd.f32 %v661_v3, %v2568_v26  ;;  %v663_v7 = vpop.f32.mrb[58].mxu0  ;;  %1045 = vmatprep.mubr.bf16.mxu1 %v769_v63  ;;  %v2637_v63 = vld [vmem:[%s3156_s4] ss:$0 sm:$0xff] }
 0x1d0   : > { %v664_v8 = vadd.f32 %v663_v7, %v2566_v25  ;;  %v665_v11 = vpop.f32.mrb[59].mxu0  ;;  %1046 = vmatmul.mubr.bf16.gmra.mrb[52].mxu1 %v768_v60  ;;  %v734_v17 = vmax.f32 %v660_v2, 0.0 }
 0x1d1   : > { %v666_v14 = vadd.f32 %v665_v11, %v2568_v26  ;;  %v735_v19 = vmax.f32 %v662_v4, 0.0 }
 0x1d2   : > { %v736_v18 = vmax.f32 %v664_v8, 0.0 }
 0x1d3   : > { %v737_v22 = vmax.f32 %v666_v14, 0.0 }
 0x1d4   : > { %v770_v23 = vpack.c.bf16 %v736_v18, %v734_v17 }
 0x1d5   : > { %v771_v24 = vpack.c.bf16 %v737_v22, %v735_v19  ;;  %v669_v0 = vpop.f32.mrb[60].mxu0 }
 0x1d6   : > { %v670_v29 = vadd.f32 %v669_v0, %v2566_v25  ;;  %v671_v30 = vpop.f32.mrb[61].mxu0 }
 0x1d7   : > { %v672_v31 = vadd.f32 %v671_v30, %v2568_v26  ;;  %v673_v32 = vpop.f32.mrb[62].mxu0  ;;  %1053 = vmatprep.mubr.bf16.mxu1 %v771_v24 }
 0x1d8   : > { %v674_v33 = vadd.f32 %v673_v32, %v2566_v25  ;;  %v675_v36 = vpop.f32.mrb[63].mxu0  ;;  %1054 = vmatmul.mubr.bf16.gmra.mrb[56].mxu1 %v770_v23  ;;  %v738_v42 = vmax.f32 %v670_v29, 0.0 }
 0x1d9   : > { %v676_v39 = vadd.f32 %v675_v36, %v2568_v26  ;;  %v739_v48 = vmax.f32 %v672_v31, 0.0 }
 0x1da   : > { %v740_v45 = vmax.f32 %v674_v33, 0.0 }
 0x1db   : > { %v741_v51 = vmax.f32 %v676_v39, 0.0 }
 0x1dc   : > { %v772_v54 = vpack.c.bf16 %v740_v45, %v738_v42 }
 0x1dd   : > { %v773_v57 = vpack.c.bf16 %v741_v51, %v739_v48 }
 0x1df   : > { %1061 = vmatprep.mubr.bf16.mxu1 %v773_v57 }
 0x1e0   : > { %1062 = vmatmul.mubr.bf16.gmra.mrb[60].mxu1 %v772_v54 }
 0x23b   : > { %v1742_v60 = vpop.f32.mrb[0].mxu1 }
 0x23c   : > { %v1743_v1 = vpop.f32.mrb[1].mxu1 }
 0x23d   : > { %v1744_v25 = vadd.f32 %v1743_v1, %v1742_v60  ;;  %v1745_v2 = vpop.f32.mrb[2].mxu1 }
 0x23e   : > { %v1746_v3 = vpop.f32.mrb[3].mxu1 }
 0x23f   : > { %v944_v26 = vadd.f32 %v1744_v25, %v2637_v63  ;;  %v1747_v4 = vadd.f32 %v1746_v3, %v1745_v2 }
 0x241   : > { %v947_v7 = vadd.f32 %v1747_v4, %v2637_v63  ;;  %v2642_v8 = vadd.f32 %v944_v26, %v2421_v20 }
 0x243   : > { %v1748_v11 = vpop.f32.mrb[4].mxu1  ;;  %1102 = vadd.xlane.f32.xlu0 %v2642_v8  ;;  %v2646_v19 = vadd.f32 %v947_v7, %v2424_v21 }
 0x244   : > { %v1749_v14 = vpop.f32.mrb[5].mxu1 }
 0x245   : > { %v1750_v17 = vadd.f32 %v1749_v14, %v1748_v11  ;;  %v1751_v18 = vpop.f32.mrb[6].mxu1 }
 0x246   : > { %v1752_v22 = vpop.f32.mrb[7].mxu1 }
 0x247   : > { %v952_v23 = vadd.f32 %v1750_v17, %v2637_v63  ;;  %v1753_v24 = vadd.f32 %v1752_v22, %v1751_v18  ;;  %1104 = vadd.xlane.f32.xlu0 %v2646_v19 }
 0x249   : > { %v955_v0 = vadd.f32 %v1753_v24, %v2637_v63  ;;  %v2652_v20 = vadd.f32 %v952_v23, %v2429_v27 }
 0x24b   : > { %v1754_v29 = vpop.f32.mrb[8].mxu1  ;;  %1106 = vadd.xlane.f32.xlu1 %v2652_v20  ;;  %v2656_v21 = vadd.f32 %v955_v0, %v2432_v28 }
 0x24c   : > { %v1755_v30 = vpop.f32.mrb[9].mxu1 }
 0x24d   : > { %v1756_v31 = vadd.f32 %v1755_v30, %v1754_v29  ;;  %v1757_v32 = vpop.f32.mrb[10].mxu1 }
 0x24e   : > { %v1758_v33 = vpop.f32.mrb[11].mxu1 }
 0x24f   : > { %v960_v36 = vadd.f32 %v1756_v31, %v2637_v63  ;;  %v1759_v39 = vadd.f32 %v1758_v33, %v1757_v32  ;;  %1108 = vadd.xlane.f32.xlu1 %v2656_v21 }
 0x251   : > { %v963_v42 = vadd.f32 %v1759_v39, %v2637_v63  ;;  %v2662_v27 = vadd.f32 %v960_v36, %v2439_v34 }
 0x253   : > { %v1760_v45 = vpop.f32.mrb[12].mxu1  ;;  %1110 = vadd.xlane.f32.xlu0 %v2662_v27  ;;  %v2666_v48 = vadd.f32 %v963_v42, %v2442_v35 }
 0x254   : > { %v1761_v51 = vpop.f32.mrb[13].mxu1 }
 0x255   : > { %v1762_v28 = vadd.f32 %v1761_v51, %v1760_v45  ;;  %v1763_v54 = vpop.f32.mrb[14].mxu1  ;;  %1112 = vadd.xlane.f32.xlu1 %v2666_v48 }
 0x256   : > { %v1764_v57 = vpop.f32.mrb[15].mxu1 }
 0x257   : > { %v968_v60 = vadd.f32 %v1762_v28, %v2637_v63  ;;  %v1765_v1 = vadd.f32 %v1764_v57, %v1763_v54 }
 0x259   : > { %v971_v25 = vadd.f32 %v1765_v1, %v2637_v63  ;;  %v2672_v34 = vadd.f32 %v968_v60, %v2448_v37 }
 0x25b   : > { %v1766_v2 = vpop.f32.mrb[16].mxu1  ;;  %1114 = vadd.xlane.f32.xlu0 %v2672_v34  ;;  %v2676_v35 = vadd.f32 %v971_v25, %v2451_v38 }
 0x25c   : > { %v1767_v3 = vpop.f32.mrb[17].mxu1 }
 0x25d   : > { %v1768_v26 = vadd.f32 %v1767_v3, %v1766_v2  ;;  %v1769_v4 = vpop.f32.mrb[18].mxu1  ;;  %1116 = vadd.xlane.f32.xlu1 %v2676_v35 }
 0x25e   : > { %v1770_v7 = vpop.f32.mrb[19].mxu1 }
 0x25f   : > { %v976_v11 = vadd.f32 %v1768_v26, %v2637_v63  ;;  %v1771_v14 = vadd.f32 %v1770_v7, %v1769_v4 }
 0x261   : > { %v979_v17 = vadd.f32 %v1771_v14, %v2637_v63  ;;  %v2682_v37 = vadd.f32 %v976_v11, %v2457_v40 }
 0x263   : > { %v1772_v18 = vpop.f32.mrb[20].mxu1  ;;  %1118 = vadd.xlane.f32.xlu0 %v2682_v37  ;;  %v2686_v38 = vadd.f32 %v979_v17, %v2460_v41 }
 0x264   : > { %v1773_v22 = vpop.f32.mrb[21].mxu1 }
 0x265   : > { %v1774_v23 = vadd.f32 %v1773_v22, %v1772_v18  ;;  %v1775_v24 = vpop.f32.mrb[22].mxu1  ;;  %1120 = vadd.xlane.f32.xlu1 %v2686_v38 }
 0x266   : > { %v1776_v0 = vpop.f32.mrb[23].mxu1 }
 0x267   : > { %v984_v29 = vadd.f32 %v1774_v23, %v2637_v63  ;;  %v1777_v30 = vadd.f32 %v1776_v0, %v1775_v24 }
 0x269   : > { %v987_v31 = vadd.f32 %v1777_v30, %v2637_v63  ;;  %v2692_v40 = vadd.f32 %v984_v29, %v2466_v43 }
 0x26b   : > { %v1778_v32 = vpop.f32.mrb[24].mxu1  ;;  %1122 = vadd.xlane.f32.xlu0 %v2692_v40  ;;  %v2696_v41 = vadd.f32 %v987_v31, %v2469_v44 }
 0x26c   : > { %v1779_v33 = vpop.f32.mrb[25].mxu1 }
 0x26d   : > { %v1780_v36 = vadd.f32 %v1779_v33, %v1778_v32  ;;  %v1781_v39 = vpop.f32.mrb[26].mxu1  ;;  %1124 = vadd.xlane.f32.xlu1 %v2696_v41 }
 0x26e   : > { %v1782_v42 = vpop.f32.mrb[27].mxu1 }
 0x26f   : > { %v992_v45 = vadd.f32 %v1780_v36, %v2637_v63  ;;  %v1783_v51 = vadd.f32 %v1782_v42, %v1781_v39 }
 0x271   : > { %v995_v28 = vadd.f32 %v1783_v51, %v2637_v63  ;;  %v2702_v43 = vadd.f32 %v992_v45, %v2475_v46 }
 0x273   : > { %v1784_v54 = vpop.f32.mrb[28].mxu1  ;;  %1126 = vadd.xlane.f32.xlu0 %v2702_v43  ;;  %v2706_v44 = vadd.f32 %v995_v28, %v2478_v47 }
 0x274   : > { %v1785_v57 = vpop.f32.mrb[29].mxu1 }
 0x275   : > { %v1786_v60 = vadd.f32 %v1785_v57, %v1784_v54  ;;  %v1787_v1 = vpop.f32.mrb[30].mxu1  ;;  %1128 = vadd.xlane.f32.xlu1 %v2706_v44 }
 0x276   : > { %v1788_v25 = vpop.f32.mrb[31].mxu1 }
 0x277   : > { %v1000_v2 = vadd.f32 %v1786_v60, %v2637_v63  ;;  %v1789_v3 = vadd.f32 %v1788_v25, %v1787_v1 }
 0x279   : > { %v1003_v26 = vadd.f32 %v1789_v3, %v2637_v63  ;;  %v2712_v46 = vadd.f32 %v1000_v2, %v2484_v49 }
 0x27b   : > { %v1790_v4 = vpop.f32.mrb[32].mxu1  ;;  %1130 = vadd.xlane.f32.xlu0 %v2712_v46  ;;  %v2716_v47 = vadd.f32 %v1003_v26, %v2487_v50 }
 0x27c   : > { %v1791_v7 = vpop.f32.mrb[33].mxu1 }
 0x27d   : > { %v1792_v11 = vadd.f32 %v1791_v7, %v1790_v4  ;;  %v1793_v14 = vpop.f32.mrb[34].mxu1  ;;  %1132 = vadd.xlane.f32.xlu1 %v2716_v47 }
 0x27e   : > { %v1794_v17 = vpop.f32.mrb[35].mxu1 }
 0x27f   : > { %v1008_v18 = vadd.f32 %v1792_v11, %v2637_v63  ;;  %v1795_v22 = vadd.f32 %v1794_v17, %v1793_v14 }
 0x281   : > { %v1011_v23 = vadd.f32 %v1795_v22, %v2637_v63  ;;  %v2722_v49 = vadd.f32 %v1008_v18, %v2493_v52 }
 0x283   : > { %v1796_v24 = vpop.f32.mrb[36].mxu1  ;;  %1134 = vadd.xlane.f32.xlu0 %v2722_v49  ;;  %v2726_v50 = vadd.f32 %v1011_v23, %v2496_v53 }
 0x284   : > { %v1797_v0 = vpop.f32.mrb[37].mxu1 }
 0x285   : > { %v1798_v29 = vadd.f32 %v1797_v0, %v1796_v24  ;;  %v1799_v30 = vpop.f32.mrb[38].mxu1  ;;  %1136 = vadd.xlane.f32.xlu1 %v2726_v50 }
 0x286   : > { %v1800_v31 = vpop.f32.mrb[39].mxu1 }
 0x287   : > { %v1016_v32 = vadd.f32 %v1798_v29, %v2637_v63  ;;  %v1801_v33 = vadd.f32 %v1800_v31, %v1799_v30 }
 0x289   : > { %v1019_v36 = vadd.f32 %v1801_v33, %v2637_v63  ;;  %v2732_v52 = vadd.f32 %v1016_v32, %v2502_v55 }
 0x28b   : > { %v1802_v39 = vpop.f32.mrb[40].mxu1  ;;  %1138 = vadd.xlane.f32.xlu0 %v2732_v52  ;;  %v2736_v53 = vadd.f32 %v1019_v36, %v2505_v56 }
 0x28c   : > { %v1803_v42 = vpop.f32.mrb[41].mxu1 }
 0x28d   : > { %v1804_v45 = vadd.f32 %v1803_v42, %v1802_v39  ;;  %v1805_v51 = vpop.f32.mrb[42].mxu1  ;;  %1140 = vadd.xlane.f32.xlu1 %v2736_v53 }
 0x28e   : > { %v1806_v28 = vpop.f32.mrb[43].mxu1 }
 0x28f   : > { %v1024_v54 = vadd.f32 %v1804_v45, %v2637_v63  ;;  %v1807_v57 = vadd.f32 %v1806_v28, %v1805_v51 }
 0x291   : > { %v1027_v60 = vadd.f32 %v1807_v57, %v2637_v63  ;;  %v2742_v55 = vadd.f32 %v1024_v54, %v2511_v58 }
 0x293   : > { %v1808_v1 = vpop.f32.mrb[44].mxu1  ;;  %1142 = vadd.xlane.f32.xlu0 %v2742_v55  ;;  %v2746_v56 = vadd.f32 %v1027_v60, %v2514_v59 }
 0x294   : > { %v1809_v25 = vpop.f32.mrb[45].mxu1 }
 0x295   : > { %v1810_v2 = vadd.f32 %v1809_v25, %v1808_v1  ;;  %v1811_v3 = vpop.f32.mrb[46].mxu1  ;;  %1144 = vadd.xlane.f32.xlu1 %v2746_v56 }
 0x296   : > { %v1812_v26 = vpop.f32.mrb[47].mxu1 }
 0x297   : > { %v1032_v4 = vadd.f32 %v1810_v2, %v2637_v63  ;;  %v1813_v7 = vadd.f32 %v1812_v26, %v1811_v3 }
 0x299   : > { %v1035_v11 = vadd.f32 %v1813_v7, %v2637_v63  ;;  %v2752_v58 = vadd.f32 %v1032_v4, %v2520_v61 }
 0x29b   : > { %v1814_v14 = vpop.f32.mrb[48].mxu1  ;;  %1146 = vadd.xlane.f32.xlu0 %v2752_v58  ;;  %v2756_v59 = vadd.f32 %v1035_v11, %v2523_v62 }
 0x29c   : > { %v1815_v17 = vpop.f32.mrb[49].mxu1 }
 0x29d   : > { %v1816_v18 = vadd.f32 %v1815_v17, %v1814_v14  ;;  %v1817_v22 = vpop.f32.mrb[50].mxu1  ;;  %1148 = vadd.xlane.f32.xlu1 %v2756_v59 }
 0x29e   : > { %v1818_v23 = vpop.f32.mrb[51].mxu1 }
 0x29f   : > { %v1040_v24 = vadd.f32 %v1816_v18, %v2637_v63  ;;  %v1819_v0 = vadd.f32 %v1818_v23, %v1817_v22 }
 0x2a1   : > { %v1043_v29 = vadd.f32 %v1819_v0, %v2637_v63  ;;  %v2762_v61 = vadd.f32 %v1040_v24, %v2529_v5 }
 0x2a3   : > { %v1820_v30 = vpop.f32.mrb[52].mxu1  ;;  %1150 = vadd.xlane.f32.xlu0 %v2762_v61  ;;  %v2766_v62 = vadd.f32 %v1043_v29, %v2532_v6 }
 0x2a4   : > { %v1821_v31 = vpop.f32.mrb[53].mxu1 }
 0x2a5   : > { %v1822_v32 = vadd.f32 %v1821_v31, %v1820_v30  ;;  %v1823_v33 = vpop.f32.mrb[54].mxu1  ;;  %1152 = vadd.xlane.f32.xlu1 %v2766_v62 }
 0x2a6   : > { %v1824_v36 = vpop.f32.mrb[55].mxu1 }
 0x2a7   : > { %v1048_v39 = vadd.f32 %v1822_v32, %v2637_v63  ;;  %v1825_v42 = vadd.f32 %v1824_v36, %v1823_v33 }
 0x2a9   : > { %v1051_v45 = vadd.f32 %v1825_v42, %v2637_v63  ;;  %v2772_v5 = vadd.f32 %v1048_v39, %v2538_v9 }
 0x2ab   : > { %v1826_v51 = vpop.f32.mrb[56].mxu1  ;;  %1154 = vadd.xlane.f32.xlu0 %v2772_v5  ;;  %v2776_v6 = vadd.f32 %v1051_v45, %v2541_v10 }
 0x2ac   : > { %v1827_v28 = vpop.f32.mrb[57].mxu1 }
 0x2ad   : > { %v1828_v54 = vadd.f32 %v1827_v28, %v1826_v51  ;;  %v1829_v57 = vpop.f32.mrb[58].mxu1  ;;  %1156 = vadd.xlane.f32.xlu1 %v2776_v6 }
 0x2ae   : > { %v1830_v60 = vpop.f32.mrb[59].mxu1 }
 0x2af   : > { %v1056_v1 = vadd.f32 %v1828_v54, %v2637_v63  ;;  %v1831_v25 = vadd.f32 %v1830_v60, %v1829_v57 }
 0x2b1   : > { %v1059_v2 = vadd.f32 %v1831_v25, %v2637_v63  ;;  %v2782_v9 = vadd.f32 %v1056_v1, %v2547_v12 }
 0x2b3   : > { %v1832_v3 = vpop.f32.mrb[60].mxu1  ;;  %1158 = vadd.xlane.f32.xlu0 %v2782_v9  ;;  %v2786_v10 = vadd.f32 %v1059_v2, %v2550_v13 }
 0x2b4   : > { %v1833_v26 = vpop.f32.mrb[61].mxu1 }
 0x2b5   : > { %v1834_v4 = vadd.f32 %v1833_v26, %v1832_v3  ;;  %v1835_v7 = vpop.f32.mrb[62].mxu1  ;;  %1160 = vadd.xlane.f32.xlu1 %v2786_v10 }
 0x2b6   : > { %v1836_v11 = vpop.f32.mrb[63].mxu1 }
 0x2b7   : > { %v1064_v14 = vadd.f32 %v1834_v4, %v2637_v63  ;;  %v1837_v17 = vadd.f32 %v1836_v11, %v1835_v7 }
 0x2b9   : > { %v1067_v18 = vadd.f32 %v1837_v17, %v2637_v63  ;;  %v2792_v12 = vadd.f32 %v1064_v14, %v2556_v15 }
 0x2bb   : > { %1162 = vadd.xlane.f32.xlu0 %v2792_v12  ;;  %v2796_v22 = vadd.f32 %v1067_v18, %v2559_v16 }
 0x2bd   : > { %1164 = vadd.xlane.f32.xlu1 %v2796_v22 }
 0x2d0   : > { %v1103_v13 = vpop.xlane.xlu0 %1102 }
 0x2d1   : > { %v1167_v23 = vmul.f32 0.0078125, %v1103_v13 }
 0x2d3   : > { %v2800_v24 = vsub.f32 %v2642_v8, %v1167_v23 }
 0x2d4   : > { %v1105_v0 = vpop.xlane.xlu0 %1104 }
 0x2d5   : > { %v1168_v29 = vmul.f32 0.0078125, %v1105_v0  ;;  %v1231_v63 = vmul.f32 %v2800_v24, %v2800_v24 }
 0x2d7   : > { %v2805_v15 = vsub.f32 %v2646_v19, %v1168_v29  ;;  %1263 = vadd.xlane.f32.xlu0 %v1231_v63 }
 0x2d8   : > { %v1107_v30 = vpop.xlane.xlu1 %1106 }
 0x2d9   : > { %v1169_v31 = vmul.f32 0.0078125, %v1107_v30  ;;  %v1232_v16 = vmul.f32 %v2805_v15, %v2805_v15 }
 0x2db   : > { %v2810_v32 = vsub.f32 %v2652_v20, %v1169_v31  ;;  %1265 = vadd.xlane.f32.xlu1 %v1232_v16 }
 0x2dc   : > { %v1109_v8 = vpop.xlane.xlu1 %1108 }
 0x2dd   : > { %v1170_v33 = vmul.f32 0.0078125, %v1109_v8  ;;  %v1233_v36 = vmul.f32 %v2810_v32, %v2810_v32 }
 0x2df   : > { %v2815_v39 = vsub.f32 %v2656_v21, %v1170_v33  ;;  %1267 = vadd.xlane.f32.xlu0 %v1233_v36 }
 0x2e0   : > { %v1111_v19 = vpop.xlane.xlu0 %1110 }
 0x2e1   : > { %v1171_v42 = vmul.f32 0.0078125, %v1111_v19  ;;  %v1234_v45 = vmul.f32 %v2815_v39, %v2815_v39 }
 0x2e2   : > { %v1113_v51 = vpop.xlane.xlu1 %1112 }
 0x2e3   : > { %v2820_v28 = vsub.f32 %v2662_v27, %v1171_v42  ;;  %v1172_v20 = vmul.f32 0.0078125, %v1113_v51  ;;  %1269 = vadd.xlane.f32.xlu1 %v1234_v45 }
 0x2e5   : > { %v2823_v54 = vsub.f32 %v2666_v48, %v1172_v20  ;;  %v1235_v57 = vmul.f32 %v2820_v28, %v2820_v28 }
 0x2e7   : > { %1271 = vadd.xlane.f32.xlu0 %v1235_v57  ;;  %v1236_v21 = vmul.f32 %v2823_v54, %v2823_v54 }
 0x2e8   : > { %v1115_v60 = vpop.xlane.xlu0 %1114 }
 0x2e9   : > { %v1173_v1 = vmul.f32 0.0078125, %v1115_v60  ;;  %1273 = vadd.xlane.f32.xlu1 %v1236_v21 }
 0x2ea   : > { %v1117_v25 = vpop.xlane.xlu1 %1116 }
 0x2eb   : > { %v2830_v2 = vsub.f32 %v2672_v34, %v1173_v1  ;;  %v1174_v27 = vmul.f32 0.0078125, %v1117_v25 }
 0x2ed   : > { %v2833_v3 = vsub.f32 %v2676_v35, %v1174_v27  ;;  %v1237_v48 = vmul.f32 %v2830_v2, %v2830_v2 }
 0x2ef   : > { %1275 = vadd.xlane.f32.xlu0 %v1237_v48  ;;  %v1238_v26 = vmul.f32 %v2833_v3, %v2833_v3 }
 0x2f0   : > { %v1119_v4 = vpop.xlane.xlu0 %1118 }
 0x2f1   : > { %v1175_v7 = vmul.f32 0.0078125, %v1119_v4  ;;  %1277 = vadd.xlane.f32.xlu1 %v1238_v26 }
 0x2f2   : > { %v1121_v11 = vpop.xlane.xlu1 %1120 }
 0x2f3   : > { %v2840_v14 = vsub.f32 %v2682_v37, %v1175_v7  ;;  %v1176_v34 = vmul.f32 0.0078125, %v1121_v11 }
 0x2f5   : > { %v2843_v17 = vsub.f32 %v2686_v38, %v1176_v34  ;;  %v1239_v35 = vmul.f32 %v2840_v14, %v2840_v14 }
 0x2f7   : > { %1279 = vadd.xlane.f32.xlu0 %v1239_v35  ;;  %v1240_v18 = vmul.f32 %v2843_v17, %v2843_v17 }
 0x2f8   : > { %v1123_v13 = vpop.xlane.xlu0 %1122 }
 0x2f9   : > { %v1177_v23 = vmul.f32 0.0078125, %v1123_v13  ;;  %1281 = vadd.xlane.f32.xlu1 %v1240_v18 }
 0x2fa   : > { %v1125_v0 = vpop.xlane.xlu1 %1124 }
 0x2fb   : > { %v2850_v29 = vsub.f32 %v2692_v40, %v1177_v23  ;;  %v1178_v37 = vmul.f32 0.0078125, %v1125_v0 }
 0x2fd   : > { %v2853_v63 = vsub.f32 %v2696_v41, %v1178_v37  ;;  %v1241_v38 = vmul.f32 %v2850_v29, %v2850_v29 }
 0x2ff   : > { %1283 = vadd.xlane.f32.xlu0 %v1241_v38  ;;  %v1242_v30 = vmul.f32 %v2853_v63, %v2853_v63 }
 0x300   : > { %v1127_v31 = vpop.xlane.xlu0 %1126 }
 0x301   : > { %v1179_v16 = vmul.f32 0.0078125, %v1127_v31  ;;  %1285 = vadd.xlane.f32.xlu1 %v1242_v30 }
 0x302   : > { %v1129_v8 = vpop.xlane.xlu1 %1128 }
 0x303   : > { %v2860_v33 = vsub.f32 %v2702_v43, %v1179_v16  ;;  %v1180_v40 = vmul.f32 0.0078125, %v1129_v8 }
 0x305   : > { %v2863_v36 = vsub.f32 %v2706_v44, %v1180_v40  ;;  %v1243_v41 = vmul.f32 %v2860_v33, %v2860_v33 }
 0x307   : > { %1287 = vadd.xlane.f32.xlu0 %v1243_v41  ;;  %v1244_v19 = vmul.f32 %v2863_v36, %v2863_v36 }
 0x308   : > { %v1131_v42 = vpop.xlane.xlu0 %1130 }
 0x309   : > { %v1181_v45 = vmul.f32 0.0078125, %v1131_v42  ;;  %1289 = vadd.xlane.f32.xlu1 %v1244_v19 }
 0x30a   : > { %v1133_v51 = vpop.xlane.xlu1 %1132 }
 0x30b   : > { %v2870_v20 = vsub.f32 %v2712_v46, %v1181_v45  ;;  %v1182_v43 = vmul.f32 0.0078125, %v1133_v51 }
 0x30d   : > { %v2873_v57 = vsub.f32 %v2716_v47, %v1182_v43  ;;  %v1245_v44 = vmul.f32 %v2870_v20, %v2870_v20 }
 0x30f   : > { %1291 = vadd.xlane.f32.xlu0 %v1245_v44  ;;  %v1246_v21 = vmul.f32 %v2873_v57, %v2873_v57 }
 0x310   : > { %v1135_v60 = vpop.xlane.xlu0 %1134 }
 0x311   : > { %v1183_v1 = vmul.f32 0.0078125, %v1135_v60  ;;  %1293 = vadd.xlane.f32.xlu1 %v1246_v21 }
 0x312   : > { %v1137_v25 = vpop.xlane.xlu1 %1136 }
 0x313   : > { %v2880_v27 = vsub.f32 %v2722_v49, %v1183_v1  ;;  %v1184_v46 = vmul.f32 0.0078125, %v1137_v25 }
 0x315   : > { %v2883_v48 = vsub.f32 %v2726_v50, %v1184_v46  ;;  %v1247_v47 = vmul.f32 %v2880_v27, %v2880_v27 }
 0x317   : > { %1295 = vadd.xlane.f32.xlu0 %v1247_v47  ;;  %v1248_v26 = vmul.f32 %v2883_v48, %v2883_v48 }
 0x318   : > { %v1139_v4 = vpop.xlane.xlu0 %1138 }
 0x319   : > { %v1185_v7 = vmul.f32 0.0078125, %v1139_v4  ;;  %1297 = vadd.xlane.f32.xlu1 %v1248_v26 }
 0x31a   : > { %v1141_v11 = vpop.xlane.xlu1 %1140 }
 0x31b   : > { %v2890_v34 = vsub.f32 %v2732_v52, %v1185_v7  ;;  %v1186_v49 = vmul.f32 0.0078125, %v1141_v11 }
 0x31d   : > { %v2893_v35 = vsub.f32 %v2736_v53, %v1186_v49  ;;  %v1249_v50 = vmul.f32 %v2890_v34, %v2890_v34 }
 0x31f   : > { %1299 = vadd.xlane.f32.xlu0 %v1249_v50  ;;  %v1250_v18 = vmul.f32 %v2893_v35, %v2893_v35 }
 0x320   : > { %v1143_v13 = vpop.xlane.xlu0 %1142 }
 0x321   : > { %v1187_v23 = vmul.f32 0.0078125, %v1143_v13  ;;  %1301 = vadd.xlane.f32.xlu1 %v1250_v18 }
 0x322   : > { %v1145_v0 = vpop.xlane.xlu1 %1144 }
 0x323   : > { %v2900_v37 = vsub.f32 %v2742_v55, %v1187_v23  ;;  %v1188_v52 = vmul.f32 0.0078125, %v1145_v0 }
 0x325   : > { %v2903_v38 = vsub.f32 %v2746_v56, %v1188_v52  ;;  %v1251_v53 = vmul.f32 %v2900_v37, %v2900_v37 }
 0x327   : > { %1303 = vadd.xlane.f32.xlu0 %v1251_v53  ;;  %v1252_v30 = vmul.f32 %v2903_v38, %v2903_v38 }
 0x328   : > { %v1147_v31 = vpop.xlane.xlu0 %1146 }
 0x329   : > { %v1189_v16 = vmul.f32 0.0078125, %v1147_v31  ;;  %1305 = vadd.xlane.f32.xlu1 %v1252_v30 }
 0x32a   : > { %v1149_v8 = vpop.xlane.xlu1 %1148 }
 0x32b   : > { %v2910_v40 = vsub.f32 %v2752_v58, %v1189_v16  ;;  %v1190_v55 = vmul.f32 0.0078125, %v1149_v8 }
 0x32d   : > { %v2913_v41 = vsub.f32 %v2756_v59, %v1190_v55  ;;  %v1253_v56 = vmul.f32 %v2910_v40, %v2910_v40 }
 0x32f   : > { %1307 = vadd.xlane.f32.xlu0 %v1253_v56  ;;  %v1254_v19 = vmul.f32 %v2913_v41, %v2913_v41 }
 0x330   : > { %v1151_v42 = vpop.xlane.xlu0 %1150 }
 0x331   : > { %v1191_v45 = vmul.f32 0.0078125, %v1151_v42  ;;  %1309 = vadd.xlane.f32.xlu1 %v1254_v19 }
 0x332   : > { %v1153_v51 = vpop.xlane.xlu1 %1152 }
 0x333   : > { %v2920_v43 = vsub.f32 %v2762_v61, %v1191_v45  ;;  %v1192_v58 = vmul.f32 0.0078125, %v1153_v51 }
 0x335   : > { %v2923_v44 = vsub.f32 %v2766_v62, %v1192_v58  ;;  %v1255_v59 = vmul.f32 %v2920_v43, %v2920_v43 }
 0x337   : > { %1311 = vadd.xlane.f32.xlu0 %v1255_v59  ;;  %v1256_v21 = vmul.f32 %v2923_v44, %v2923_v44  ;;  %v2962_v59 = vld [vmem:[%s3157_s5] ss:$0 sm:$0xff] }
 0x338   : > { %v1155_v60 = vpop.xlane.xlu0 %1154 }
 0x339   : > { %v1193_v1 = vmul.f32 0.0078125, %v1155_v60  ;;  %1313 = vadd.xlane.f32.xlu1 %v1256_v21 }
 0x33a   : > { %v1157_v25 = vpop.xlane.xlu1 %1156 }
 0x33b   : > { %v2930_v46 = vsub.f32 %v2772_v5, %v1193_v1  ;;  %v1194_v61 = vmul.f32 0.0078125, %v1157_v25  ;;  %v2968_v25 = vld [vmem:[%s3158_s6] ss:$0 sm:$0xff] }
 0x33d   : > { %v2933_v47 = vsub.f32 %v2776_v6, %v1194_v61  ;;  %v1257_v62 = vmul.f32 %v2930_v46, %v2930_v46 }
 0x33f   : > { %1315 = vadd.xlane.f32.xlu0 %v1257_v62  ;;  %v1258_v26 = vmul.f32 %v2933_v47, %v2933_v47 }
 0x340   : > { %v1159_v4 = vpop.xlane.xlu0 %1158 }
 0x341   : > { %v1195_v7 = vmul.f32 0.0078125, %v1159_v4  ;;  %1317 = vadd.xlane.f32.xlu1 %v1258_v26 }
 0x342   : > { %v1161_v11 = vpop.xlane.xlu1 %1160 }
 0x343   : > { %v2940_v49 = vsub.f32 %v2782_v9, %v1195_v7  ;;  %v1196_v5 = vmul.f32 0.0078125, %v1161_v11 }
 0x345   : > { %v2943_v50 = vsub.f32 %v2786_v10, %v1196_v5  ;;  %v1259_v6 = vmul.f32 %v2940_v49, %v2940_v49 }
 0x347   : > { %1319 = vadd.xlane.f32.xlu0 %v1259_v6  ;;  %v1260_v18 = vmul.f32 %v2943_v50, %v2943_v50 }
 0x348   : > { %v1163_v13 = vpop.xlane.xlu0 %1162 }
 0x349   : > { %v1197_v23 = vmul.f32 0.0078125, %v1163_v13  ;;  %1321 = vadd.xlane.f32.xlu1 %v1260_v18 }
 0x34a   : > { %v1165_v0 = vpop.xlane.xlu1 %1164 }
 0x34b   : > { %v2950_v52 = vsub.f32 %v2792_v12, %v1197_v23  ;;  %v1198_v9 = vmul.f32 0.0078125, %v1165_v0 }
 0x34d   : > { %v2953_v53 = vsub.f32 %v2796_v22, %v1198_v9  ;;  %v1261_v10 = vmul.f32 %v2950_v52, %v2950_v52 }
 0x34f   : > { %1323 = vadd.xlane.f32.xlu0 %v1261_v10  ;;  %v1262_v30 = vmul.f32 %v2953_v53, %v2953_v53 }
 0x351   : > { %1325 = vadd.xlane.f32.xlu1 %v1262_v30 }
 0x364   : > { %v1264_v31 = vpop.xlane.xlu0 %1263 }
 0x365   : > { %v1327_v16 = vmul.f32 0.007874016, %v1264_v31 }
 0x367   : > { %v1360_v8 = vadd.f32 1e-06, %v1327_v16 }
 0x368   : > { %v1266_v55 = vpop.xlane.xlu1 %1265 }
 0x369   : > { %1952 = vrsqrt.f32 %v1360_v8  ;;  %v1328_v56 = vmul.f32 0.007874016, %v1266_v55 }
 0x36b   : > { %v1361_v12 = vadd.f32 1e-06, %v1328_v56 }
 0x36c   : > { %v1268_v19 = vpop.xlane.xlu0 %1267 }
 0x36d   : > { %1954 = vrsqrt.f32 %v1361_v12  ;;  %v1329_v42 = vmul.f32 0.007874016, %v1268_v19 }
 0x36f   : > { %v1362_v22 = vadd.f32 1e-06, %v1329_v42 }
 0x370   : > { %v1270_v45 = vpop.xlane.xlu1 %1269 }
 0x371   : > { %1956 = vrsqrt.f32 %v1362_v22  ;;  %v1330_v51 = vmul.f32 0.007874016, %v1270_v45 }
 0x373   : > { %v1953_v58 = vpop.eup %1952  ;;  %v1363_v21 = vadd.f32 1e-06, %v1330_v51 }
 0x374   : > { %v1424_v60 = vmul.f32 %v1953_v58, %v2800_v24  ;;  %v1272_v1 = vpop.xlane.xlu0 %1271 }
 0x375   : > { %1958 = vrsqrt.f32 %v1363_v21  ;;  %v1331_v61 = vmul.f32 0.007874016, %v1272_v1 }
 0x376   : > { %v1462_v62 = vmul.f32 %v2962_v59, %v1424_v60  ;;  %v1274_v26 = vpop.xlane.xlu1 %1273 }
 0x377   : > { %v1955_v4 = vpop.eup %1954  ;;  %v1364_v7 = vadd.f32 1e-06, %v1331_v61  ;;  %v1332_v11 = vmul.f32 0.007874016, %v1274_v26 }
 0x378   : > { %v1501_v5 = vadd.f32 %v2968_v25, %v1462_v62  ;;  %v1425_v6 = vmul.f32 %v1955_v4, %v2805_v15 }
 0x379   : > { %1960 = vrsqrt.f32 %v1364_v7  ;;  %v1365_v24 = vadd.f32 1e-06, %v1332_v11 }
 0x37a   : > { %1533 = vst [vmem:[%s2975_s22] sm:$0xff] %v1501_v5  ;;  %v1463_v18 = vmul.f32 %v2962_v59, %v1425_v6 }
 0x37b   : > { %v1957_v13 = vpop.eup %1956  ;;  %1962 = vrsqrt.f32 %v1365_v24 }
 0x37c   : > { %v1502_v23 = vadd.f32 %v2968_v25, %v1463_v18  ;;  %v1426_v0 = vmul.f32 %v1957_v13, %v2810_v32  ;;  %v1276_v9 = vpop.xlane.xlu0 %1275 }
 0x37d   : > { %v1333_v10 = vmul.f32 0.007874016, %v1276_v9 }
 0x37e   : > { %1534 = vst [vmem:[%s2975_s22 + $0x8] sm:$0xff] %v1502_v23  ;;  %v1464_v15 = vmul.f32 %v2962_v59, %v1426_v0  ;;  %v1278_v30 = vpop.xlane.xlu1 %1277 }
 0x37f   : > { %v1959_v31 = vpop.eup %1958  ;;  %v1366_v16 = vadd.f32 1e-06, %v1333_v10  ;;  %v1334_v8 = vmul.f32 0.007874016, %v1278_v30 }
 0x380   : > { %v1503_v55 = vadd.f32 %v2968_v25, %v1464_v15  ;;  %v1427_v56 = vmul.f32 %v1959_v31, %v2815_v39 }
 0x381   : > { %1964 = vrsqrt.f32 %v1366_v16  ;;  %v1367_v12 = vadd.f32 1e-06, %v1334_v8 }
 0x382   : > { %1535 = vst [vmem:[%s2975_s22 + $0x10] sm:$0xff] %v1503_v55  ;;  %v1465_v19 = vmul.f32 %v2962_v59, %v1427_v56 }
 0x383   : > { %v1961_v32 = vpop.eup %1960  ;;  %1966 = vrsqrt.f32 %v1367_v12 }
 0x384   : > { %v1504_v42 = vadd.f32 %v2968_v25, %v1465_v19  ;;  %v1428_v22 = vmul.f32 %v1961_v32, %v2820_v28  ;;  %v1280_v45 = vpop.xlane.xlu0 %1279 }
 0x385   : > { %v1963_v51 = vpop.eup %1962  ;;  %v1335_v58 = vmul.f32 0.007874016, %v1280_v45 }
 0x386   : > { %1536 = vst [vmem:[%s2975_s22 + $0x18] sm:$0xff] %v1504_v42  ;;  %v1466_v21 = vmul.f32 %v2962_v59, %v1428_v22  ;;  %v1429_v39 = vmul.f32 %v1963_v51, %v2823_v54  ;;  %v1282_v60 = vpop.xlane.xlu1 %1281 }
 0x387   : > { %v1368_v1 = vadd.f32 1e-06, %v1335_v58  ;;  %v1336_v61 = vmul.f32 0.007874016, %v1282_v60 }
 0x388   : > { %v1505_v62 = vadd.f32 %v2968_v25, %v1466_v21  ;;  %v1467_v26 = vmul.f32 %v2962_v59, %v1429_v39 }
 0x389   : > { %1968 = vrsqrt.f32 %v1368_v1  ;;  %v1369_v4 = vadd.f32 1e-06, %v1336_v61 }
 0x38a   : > { %1537 = vst [vmem:[%s2975_s22 + $0x20] sm:$0xff] %v1505_v62  ;;  %v1506_v28 = vadd.f32 %v2968_v25, %v1467_v26 }
 0x38b   : > { %v1965_v7 = vpop.eup %1964  ;;  %1970 = vrsqrt.f32 %v1369_v4 }
 0x38c   : > { %1538 = vst [vmem:[%s2975_s22 + $0x28] sm:$0xff] %v1506_v28  ;;  %v1430_v11 = vmul.f32 %v1965_v7, %v2830_v2  ;;  %v1284_v5 = vpop.xlane.xlu0 %1283 }
 0x38d   : > { %v1967_v54 = vpop.eup %1966  ;;  %v1337_v6 = vmul.f32 0.007874016, %v1284_v5 }
 0x38e   : > { %v1468_v24 = vmul.f32 %v2962_v59, %v1430_v11  ;;  %v1431_v18 = vmul.f32 %v1967_v54, %v2833_v3  ;;  %v1286_v13 = vpop.xlane.xlu1 %1285 }
 0x38f   : > { %v1370_v23 = vadd.f32 1e-06, %v1337_v6  ;;  %v1338_v0 = vmul.f32 0.007874016, %v1286_v13 }
 0x390   : > { %v1507_v9 = vadd.f32 %v2968_v25, %v1468_v24  ;;  %v1469_v10 = vmul.f32 %v2962_v59, %v1431_v18 }
 0x391   : > { %1972 = vrsqrt.f32 %v1370_v23  ;;  %v1371_v15 = vadd.f32 1e-06, %v1338_v0 }
 0x392   : > { %1539 = vst [vmem:[%s2975_s22 + $0x30] sm:$0xff] %v1507_v9  ;;  %v1508_v2 = vadd.f32 %v2968_v25, %v1469_v10 }
 0x393   : > { %v1969_v30 = vpop.eup %1968  ;;  %1974 = vrsqrt.f32 %v1371_v15 }
 0x394   : > { %1540 = vst [vmem:[%s2975_s22 + $0x38] sm:$0xff] %v1508_v2  ;;  %v1432_v31 = vmul.f32 %v1969_v30, %v2840_v14  ;;  %v1288_v16 = vpop.xlane.xlu0 %1287 }
 0x395   : > { %v1971_v3 = vpop.eup %1970  ;;  %v1339_v8 = vmul.f32 0.007874016, %v1288_v16 }
 0x396   : > { %v1470_v55 = vmul.f32 %v2962_v59, %v1432_v31  ;;  %v1433_v56 = vmul.f32 %v1971_v3, %v2843_v17  ;;  %v1290_v12 = vpop.xlane.xlu1 %1289 }
 0x397   : > { %v1372_v19 = vadd.f32 1e-06, %v1339_v8  ;;  %v1340_v32 = vmul.f32 0.007874016, %v1290_v12 }
 0x398   : > { %v1509_v42 = vadd.f32 %v2968_v25, %v1470_v55  ;;  %v1471_v22 = vmul.f32 %v2962_v59, %v1433_v56 }
 0x399   : > { %1976 = vrsqrt.f32 %v1372_v19  ;;  %v1373_v45 = vadd.f32 1e-06, %v1340_v32 }
 0x39a   : > { %1541 = vst [vmem:[%s2975_s22 + $0x40] sm:$0xff] %v1509_v42  ;;  %v1510_v14 = vadd.f32 %v2968_v25, %v1471_v22 }
 0x39b   : > { %v1973_v51 = vpop.eup %1972  ;;  %1978 = vrsqrt.f32 %v1373_v45 }
 0x39c   : > { %1542 = vst [vmem:[%s2975_s22 + $0x48] sm:$0xff] %v1510_v14  ;;  %v1434_v58 = vmul.f32 %v1973_v51, %v2850_v29  ;;  %v1292_v21 = vpop.xlane.xlu0 %1291 }
 0x39d   : > { %v1975_v17 = vpop.eup %1974  ;;  %v1341_v39 = vmul.f32 0.007874016, %v1292_v21 }
 0x39e   : > { %v1472_v60 = vmul.f32 %v2962_v59, %v1434_v58  ;;  %v1435_v1 = vmul.f32 %v1975_v17, %v2853_v63  ;;  %v1294_v61 = vpop.xlane.xlu1 %1293 }
 0x39f   : > { %v1374_v62 = vadd.f32 1e-06, %v1341_v39  ;;  %v1342_v26 = vmul.f32 0.007874016, %v1294_v61 }
 0x3a0   : > { %v1511_v4 = vadd.f32 %v2968_v25, %v1472_v60  ;;  %v1473_v28 = vmul.f32 %v2962_v59, %v1435_v1 }
 0x3a1   : > { %1980 = vrsqrt.f32 %v1374_v62  ;;  %v1375_v7 = vadd.f32 1e-06, %v1342_v26 }
 0x3a2   : > { %1543 = vst [vmem:[%s2975_s22 + $0x50] sm:$0xff] %v1511_v4  ;;  %v1512_v29 = vadd.f32 %v2968_v25, %v1473_v28 }
 0x3a3   : > { %v1977_v11 = vpop.eup %1976  ;;  %1982 = vrsqrt.f32 %v1375_v7 }
 0x3a4   : > { %1544 = vst [vmem:[%s2975_s22 + $0x58] sm:$0xff] %v1512_v29  ;;  %v1436_v5 = vmul.f32 %v1977_v11, %v2860_v33  ;;  %v1296_v54 = vpop.xlane.xlu0 %1295 }
 0x3a5   : > { %v1979_v63 = vpop.eup %1978  ;;  %v1343_v6 = vmul.f32 0.007874016, %v1296_v54 }
 0x3a6   : > { %v1474_v24 = vmul.f32 %v2962_v59, %v1436_v5  ;;  %v1437_v18 = vmul.f32 %v1979_v63, %v2863_v36  ;;  %v1298_v13 = vpop.xlane.xlu1 %1297 }
 0x3a7   : > { %v1376_v23 = vadd.f32 1e-06, %v1343_v6  ;;  %v1344_v0 = vmul.f32 0.007874016, %v1298_v13 }
 0x3a8   : > { %v1513_v9 = vadd.f32 %v2968_v25, %v1474_v24  ;;  %v1475_v10 = vmul.f32 %v2962_v59, %v1437_v18 }
 0x3a9   : > { %1984 = vrsqrt.f32 %v1376_v23  ;;  %v1377_v15 = vadd.f32 1e-06, %v1344_v0 }
 0x3aa   : > { %1545 = vst [vmem:[%s2975_s22 + $0x60] sm:$0xff] %v1513_v9  ;;  %v1514_v33 = vadd.f32 %v2968_v25, %v1475_v10 }
 0x3ab   : > { %v1981_v2 = vpop.eup %1980  ;;  %1986 = vrsqrt.f32 %v1377_v15 }
 0x3ac   : > { %1546 = vst [vmem:[%s2975_s22 + $0x68] sm:$0xff] %v1514_v33  ;;  %v1438_v30 = vmul.f32 %v1981_v2, %v2870_v20  ;;  %v1300_v31 = vpop.xlane.xlu0 %1299 }
 0x3ad   : > { %v1983_v36 = vpop.eup %1982  ;;  %v1345_v16 = vmul.f32 0.007874016, %v1300_v31 }
 0x3ae   : > { %v1476_v3 = vmul.f32 %v2962_v59, %v1438_v30  ;;  %v1439_v8 = vmul.f32 %v1983_v36, %v2873_v57  ;;  %v1302_v55 = vpop.xlane.xlu1 %1301 }
 0x3af   : > { %v1378_v56 = vadd.f32 1e-06, %v1345_v16  ;;  %v1346_v12 = vmul.f32 0.007874016, %v1302_v55 }
 0x3b0   : > { %v1515_v19 = vadd.f32 %v2968_v25, %v1476_v3  ;;  %v1477_v32 = vmul.f32 %v2962_v59, %v1439_v8 }
 0x3b1   : > { %1988 = vrsqrt.f32 %v1378_v56  ;;  %v1379_v42 = vadd.f32 1e-06, %v1346_v12 }
 0x3b2   : > { %1547 = vst [vmem:[%s2975_s22 + $0x70] sm:$0xff] %v1515_v19  ;;  %v1516_v20 = vadd.f32 %v2968_v25, %v1477_v32 }
 0x3b3   : > { %v1985_v22 = vpop.eup %1984  ;;  %1990 = vrsqrt.f32 %v1379_v42 }
 0x3b4   : > { %1548 = vst [vmem:[%s2975_s22 + $0x78] sm:$0xff] %v1516_v20  ;;  %v1440_v45 = vmul.f32 %v1985_v22, %v2880_v27  ;;  %v1304_v14 = vpop.xlane.xlu0 %1303 }
 0x3b5   : > { %v1987_v57 = vpop.eup %1986  ;;  %v1347_v51 = vmul.f32 0.007874016, %v1304_v14 }
 0x3b6   : > { %v1478_v58 = vmul.f32 %v2962_v59, %v1440_v45  ;;  %v1441_v21 = vmul.f32 %v1987_v57, %v2883_v48  ;;  %v1306_v17 = vpop.xlane.xlu1 %1305 }
 0x3b7   : > { %v1380_v39 = vadd.f32 1e-06, %v1347_v51  ;;  %v1348_v60 = vmul.f32 0.007874016, %v1306_v17 }
 0x3b8   : > { %v1517_v1 = vadd.f32 %v2968_v25, %v1478_v58  ;;  %v1479_v61 = vmul.f32 %v2962_v59, %v1441_v21 }
 0x3b9   : > { %1992 = vrsqrt.f32 %v1380_v39  ;;  %v1381_v62 = vadd.f32 1e-06, %v1348_v60 }
 0x3ba   : > { %1549 = vst [vmem:[%s2975_s22 + $0x80] sm:$0xff] %v1517_v1  ;;  %v1518_v27 = vadd.f32 %v2968_v25, %v1479_v61 }
 0x3bb   : > { %v1989_v26 = vpop.eup %1988  ;;  %1994 = vrsqrt.f32 %v1381_v62 }
 0x3bc   : > { %1550 = vst [vmem:[%s2975_s22 + $0x88] sm:$0xff] %v1518_v27  ;;  %v1442_v4 = vmul.f32 %v1989_v26, %v2890_v34  ;;  %v1308_v28 = vpop.xlane.xlu0 %1307 }
 0x3bd   : > { %v1991_v48 = vpop.eup %1990  ;;  %v1349_v7 = vmul.f32 0.007874016, %v1308_v28 }
 0x3be   : > { %v1480_v29 = vmul.f32 %v2962_v59, %v1442_v4  ;;  %v1443_v11 = vmul.f32 %v1991_v48, %v2893_v35  ;;  %v1310_v5 = vpop.xlane.xlu1 %1309 }
 0x3bf   : > { %v1382_v54 = vadd.f32 1e-06, %v1349_v7  ;;  %v1350_v63 = vmul.f32 0.007874016, %v1310_v5 }
 0x3c0   : > { %v1519_v6 = vadd.f32 %v2968_v25, %v1480_v29  ;;  %v1481_v24 = vmul.f32 %v2962_v59, %v1443_v11 }
 0x3c1   : > { %1996 = vrsqrt.f32 %v1382_v54  ;;  %v1383_v18 = vadd.f32 1e-06, %v1350_v63 }
 0x3c2   : > { %1551 = vst [vmem:[%s2975_s22 + $0x90] sm:$0xff] %v1519_v6  ;;  %v1520_v34 = vadd.f32 %v2968_v25, %v1481_v24 }
 0x3c3   : > { %v1993_v13 = vpop.eup %1992  ;;  %1998 = vrsqrt.f32 %v1383_v18 }
 0x3c4   : > { %1552 = vst [vmem:[%s2975_s22 + $0x98] sm:$0xff] %v1520_v34  ;;  %v1444_v23 = vmul.f32 %v1993_v13, %v2900_v37  ;;  %v1312_v0 = vpop.xlane.xlu0 %1311 }
 0x3c5   : > { %v1995_v35 = vpop.eup %1994  ;;  %v1351_v9 = vmul.f32 0.007874016, %v1312_v0 }
 0x3c6   : > { %v1482_v10 = vmul.f32 %v2962_v59, %v1444_v23  ;;  %v1445_v15 = vmul.f32 %v1995_v35, %v2903_v38  ;;  %v1314_v33 = vpop.xlane.xlu1 %1313 }
 0x3c7   : > { %v1384_v2 = vadd.f32 1e-06, %v1351_v9  ;;  %v1352_v30 = vmul.f32 0.007874016, %v1314_v33 }
 0x3c8   : > { %v1521_v31 = vadd.f32 %v2968_v25, %v1482_v10  ;;  %v1483_v36 = vmul.f32 %v2962_v59, %v1445_v15 }
 0x3c9   : > { %2000 = vrsqrt.f32 %v1384_v2  ;;  %v1385_v16 = vadd.f32 1e-06, %v1352_v30 }
 0x3ca   : > { %1553 = vst [vmem:[%s2975_s22 + $0xa0] sm:$0xff] %v1521_v31  ;;  %v1522_v37 = vadd.f32 %v2968_v25, %v1483_v36 }
 0x3cb   : > { %v1997_v3 = vpop.eup %1996  ;;  %2002 = vrsqrt.f32 %v1385_v16 }
 0x3cc   : > { %1554 = vst [vmem:[%s2975_s22 + $0xa8] sm:$0xff] %v1522_v37  ;;  %v1446_v8 = vmul.f32 %v1997_v3, %v2910_v40  ;;  %v1316_v55 = vpop.xlane.xlu0 %1315 }
 0x3cd   : > { %v1999_v38 = vpop.eup %1998  ;;  %v1353_v56 = vmul.f32 0.007874016, %v1316_v55 }
 0x3ce   : > { %v1484_v12 = vmul.f32 %v2962_v59, %v1446_v8  ;;  %v1447_v19 = vmul.f32 %v1999_v38, %v2913_v41  ;;  %v1318_v32 = vpop.xlane.xlu1 %1317 }
 0x3cf   : > { %v1386_v42 = vadd.f32 1e-06, %v1353_v56  ;;  %v1354_v20 = vmul.f32 0.007874016, %v1318_v32 }
 0x3d0   : > { %v1523_v22 = vadd.f32 %v2968_v25, %v1484_v12  ;;  %v1485_v45 = vmul.f32 %v2962_v59, %v1447_v19 }
 0x3d1   : > { %2004 = vrsqrt.f32 %v1386_v42  ;;  %v1387_v14 = vadd.f32 1e-06, %v1354_v20 }
 0x3d2   : > { %1555 = vst [vmem:[%s2975_s22 + $0xb0] sm:$0xff] %v1523_v22  ;;  %v1524_v40 = vadd.f32 %v2968_v25, %v1485_v45 }
 0x3d3   : > { %v2001_v57 = vpop.eup %2000  ;;  %2006 = vrsqrt.f32 %v1387_v14 }
 0x3d4   : > { %1556 = vst [vmem:[%s2975_s22 + $0xb8] sm:$0xff] %v1524_v40  ;;  %v1448_v51 = vmul.f32 %v2001_v57, %v2920_v43  ;;  %v1320_v58 = vpop.xlane.xlu0 %1319 }
 0x3d5   : > { %v2003_v41 = vpop.eup %2002  ;;  %v1355_v21 = vmul.f32 0.007874016, %v1320_v58 }
 0x3d6   : > { %v1486_v17 = vmul.f32 %v2962_v59, %v1448_v51  ;;  %v1449_v39 = vmul.f32 %v2003_v41, %v2923_v44  ;;  %v1322_v60 = vpop.xlane.xlu1 %1321 }
 0x3d7   : > { %v1388_v1 = vadd.f32 1e-06, %v1355_v21  ;;  %v1356_v61 = vmul.f32 0.007874016, %v1322_v60 }
 0x3d8   : > { %v1525_v62 = vadd.f32 %v2968_v25, %v1486_v17  ;;  %v1487_v27 = vmul.f32 %v2962_v59, %v1449_v39 }
 0x3d9   : > { %2008 = vrsqrt.f32 %v1388_v1  ;;  %v1389_v26 = vadd.f32 1e-06, %v1356_v61 }
 0x3da   : > { %1557 = vst [vmem:[%s2975_s22 + $0xc0] sm:$0xff] %v1525_v62  ;;  %v1526_v43 = vadd.f32 %v2968_v25, %v1487_v27 }
 0x3db   : > { %v2005_v4 = vpop.eup %2004  ;;  %2010 = vrsqrt.f32 %v1389_v26 }
 0x3dc   : > { %1558 = vst [vmem:[%s2975_s22 + $0xc8] sm:$0xff] %v1526_v43  ;;  %v1450_v28 = vmul.f32 %v2005_v4, %v2930_v46  ;;  %v1324_v48 = vpop.xlane.xlu0 %1323 }
 0x3dd   : > { %v2007_v44 = vpop.eup %2006  ;;  %v1357_v7 = vmul.f32 0.007874016, %v1324_v48 }
 0x3de   : > { %v1488_v29 = vmul.f32 %v2962_v59, %v1450_v28  ;;  %v1451_v11 = vmul.f32 %v2007_v44, %v2933_v47  ;;  %v1326_v5 = vpop.xlane.xlu1 %1325 }
 0x3df   : > { %v1390_v54 = vadd.f32 1e-06, %v1357_v7  ;;  %v1358_v63 = vmul.f32 0.007874016, %v1326_v5 }
 0x3e0   : > { %v1527_v6 = vadd.f32 %v2968_v25, %v1488_v29  ;;  %v1489_v24 = vmul.f32 %v2962_v59, %v1451_v11 }
 0x3e1   : > { %2012 = vrsqrt.f32 %v1390_v54  ;;  %v1391_v18 = vadd.f32 1e-06, %v1358_v63 }
 0x3e2   : > { %1559 = vst [vmem:[%s2975_s22 + $0xd0] sm:$0xff] %v1527_v6  ;;  %v1528_v46 = vadd.f32 %v2968_v25, %v1489_v24 }
 0x3e3   : > { %v2009_v34 = vpop.eup %2008  ;;  %2014 = vrsqrt.f32 %v1391_v18 }
 0x3e4   : > { %1560 = vst [vmem:[%s2975_s22 + $0xd8] sm:$0xff] %v1528_v46  ;;  %v1452_v47 = vmul.f32 %v2009_v34, %v2940_v49 }
 0x3e5   : > { %v2011_v13 = vpop.eup %2010 }
 0x3e6   : > { %v1490_v23 = vmul.f32 %v2962_v59, %v1452_v47  ;;  %v1453_v0 = vmul.f32 %v2011_v13, %v2943_v50 }
 0x3e8   : > { %v1529_v35 = vadd.f32 %v2968_v25, %v1490_v23  ;;  %v1491_v9 = vmul.f32 %v2962_v59, %v1453_v0 }
 0x3ea   : > { %1561 = vst [vmem:[%s2975_s22 + $0xe0] sm:$0xff] %v1529_v35  ;;  %v1530_v10 = vadd.f32 %v2968_v25, %v1491_v9 }
 0x3eb   : > { %v2013_v15 = vpop.eup %2012 }
 0x3ec   : > { %1562 = vst [vmem:[%s2975_s22 + $0xe8] sm:$0xff] %v1530_v10  ;;  %v1454_v33 = vmul.f32 %v2013_v15, %v2950_v52 }
 0x3ed   : > { %v2015_v49 = vpop.eup %2014 }
 0x3ee   : > { %v1492_v2 = vmul.f32 %v2962_v59, %v1454_v33  ;;  %v1455_v50 = vmul.f32 %v2015_v49, %v2953_v53 }
 0x3f0   : > { %v1531_v30 = vadd.f32 %v2968_v25, %v1492_v2  ;;  %v1493_v31 = vmul.f32 %v2962_v59, %v1455_v50 }
 0x3f2   : > { %1563 = vst [vmem:[%s2975_s22 + $0xf0] sm:$0xff] %v1531_v30  ;;  %v1532_v52 = vadd.f32 %v2968_v25, %v1493_v31 }
 0x3f4   : > { %1564 = vst [vmem:[%s2975_s22 + $0xf8] sm:$0xff] %v1532_v52 }
 0x3f5   : > { %2115 = shalt.err (!%p2112_p1)
}
 0x3f6   : > { %s2116_s18 = scalar_lea.hbm %s3103_s30, 4096  ;;  %s2120_s22 = scalar_lea.hbm %s3159_s7, 8192 }
 0x3f7   : > { %p2117_p13 = scmp.ne.s32.totalorder %s3103_s30, %s2116_s18  ;;  %p2121_p4 = scmp.lt.u32.totalorder %s3103_s30, %s3159_s7 }
 0x3f8   : > { %p2122_p7 = scmp.lt.u32.totalorder %s2120_s22, %s2116_s18  ;;  %p2124_p11 = scmp.lt.u32.totalorder %s2116_s18, %s3103_s30 }
 0x3f9   : > { %p2118_p6 = pnand %p2117_p13, %p3175_p0 }
 0x3fa   : > { %p2123_p8 = por %p2122_p7, %p2121_p4 }
 0x3fb   : > { %p2119_p10 = pneg %p2118_p6 }
 0x3fc   : > { %p2125_p2 = por %p2124_p11, %p2123_p8 }
 0x3fe   : > { %p2126_p3 = pnand %p2125_p2, %p2119_p10 }
 0x400   : > { %2129 = shalt.err (!%p2126_p3)
}
 0x401   : > { %s2183_s17 = smov 128   ;;  %s2184_s9 = smov 8  }
 0x402   : > { %1848 = dma.vmem_to_hbm [thread:$0]  (%p3175_p0), %s3105_s13, 4096, %s3103_s30, %s1566_s28, %s2183_s17, %s2183_s17, %s2184_s9  }
 0x403 PF: > { %s1594_s29 = sand.u32 1, %s2160_s24   ;;  %p3176_p5 = scmp.ne.s32.totalorder %s3165_s8, 0 }
 0x404   : > { %p3177_p9 = scmp.ge.s32.totalorder %s2172_s27, 2  ;;  %s1595_s10 = scalar_lea.sflag [#allocation4], %s1594_s29 }
 0x406   : > { %p1862_p12 = pnand %p3177_p9, %p3176_p5 }
 0x408   : > { %2155 = dma.done.wait (!%p1862_p12), %s1595_s10, 4096  }
 0x409   : > { %2157 = vsyncadd (!%p1862_p12), %s1595_s10, 4294963200  ;;  %p21_p1 = scmp.ge.s32.totalorder %s2338_s16, 4   ;;  %s3178_s24 = smov %s2164_s25 }
 0x40a   : > { %s3179_s25 = smov %s2168_s26  ;;  %s3180_s26 = smov %s2347_s19 }
 0x40b   : > { %s3181_s27 = smov %s2338_s16  ;;  %23 = sbr.rel (!%p21_p1) target bundleno = 6 (0x6), region = 101 }
 0x412   :  { %1600 = vsyncpa [#allocation3], 1 }
 0x413   :  { %1602 = vsyncpa [#allocation3 + $0x1], 1 }
 0x414   :  { %1603 = vsyncpa [#allocation6], 1 }
 0x415   :  { %1604 = vsyncpa [#allocation4], 1 }
 0x416   :  { %1606 = vsyncpa [#allocation4 + $0x1], 1 }

</bundles_post_ra>
